<compile_context>
chip_gen: v6e
topology: v6e:2x2x1
jax: 0.10.0
libtpu: 0.0.40
codegen_flags: <defaults>
</compile_context>

<pallas_src>
import functools

import jax
import jax.numpy as jnp
import numpy as np
from jax import lax
from jax.experimental import pallas as pl
from jax.experimental.pallas import tpu as pltpu


def _round_up(x, m):
    return (x + m - 1) // m * m


def convlstm_cell_kernel(xh_ref, w_ref, c_ref, h_out_ref, c_out_ref,
                         *, K, Wp, N, Chid):
    """Single-invocation ConvLSTM cell (all batches folded into lanes).

    xh_ref: (Cpad, L_flat)        bf16, batch-stacked, halo-padded, flattened
    w_ref:  (K*K, 4*Chid, Cpad)   bf16 per-tap weights; bias folded into the
                                  centre tap's "ones" channel column
    c_ref:  (Chid, N)             f32 cell state in the same stacked layout
    h_out_ref, c_out_ref: (Chid, N) f32
    """
    # Convolution as K*K accumulated matmuls over shifted lane slices.
    gates = None
    for dy in range(K):
        for dx in range(K):
            t = dy * K + dx
            off = dy * Wp + dx
            tap = xh_ref[:, off:off + N]                        # (Cpad, N) bf16
            part = jnp.dot(w_ref[t], tap,
                           preferred_element_type=jnp.float32)  # (4*Chid, N) f32
            gates = part if gates is None else gates + part

    # Gate split = cheap sublane slices (PyTorch ordering i, f, o, g).
    cc_i = gates[0 * Chid:1 * Chid, :]
    cc_f = gates[1 * Chid:2 * Chid, :]
    cc_o = gates[2 * Chid:3 * Chid, :]
    cc_g = gates[3 * Chid:4 * Chid, :]

    def sigmoid(z):                      # one EUP push instead of exp + recip
        return 0.5 * jnp.tanh(0.5 * z) + 0.5

    i = sigmoid(cc_i)
    f = sigmoid(cc_f)
    o = sigmoid(cc_o)
    g = jnp.tanh(cc_g)

    c_next = f * c_ref[...] + i * g
    h_next = o * jnp.tanh(c_next)

    # Lane-dense full-ref stores.
    c_out_ref[...] = c_next
    h_out_ref[...] = h_next


def convlstm_cell_forward(x_nchw, h_nchw, c_nchw, weight_oihw, bias):
    """PyTorch-equivalent ConvLSTMCell.forward.

    x_nchw: (B, Cin, H, W); h_nchw, c_nchw: (B, Chid, H, W)
    weight_oihw: (4*Chid, Cin+Chid, K, K); bias: (4*Chid,)
    Returns (h_next, c_next) in NCHW, float32.
    """
    B, Cin, H, W = x_nchw.shape
    Chid = h_nchw.shape[1]
    K = weight_oihw.shape[-1]
    # nn.Conv2d(padding=K//2) is only "same"-sized for odd K.
    assert K % 2 == 1, "ConvLSTMCell Pallas kernel requires odd kernel_size"
    pad = K // 2
    Cin_tot = Cin + Chid
    Cpad = _round_up(Cin_tot + 1, 8)          # +1 for the bias ("ones") channel
    Hp, Wp = H + 2 * pad, W + 2 * pad
    N = B * Hp * Wp                           # gate columns (batch-stacked)
    L_flat = _round_up(N + (K - 1) * (Wp + 1), 128)

    f32, bf16 = jnp.float32, jnp.bfloat16

    # ---- packed input: [x, h, ones(bias), zero-pad] along channels, halo-pad
    #      spatially, stack batches vertically, flatten row-major, tail-pad.
    ones_ch = jnp.ones((B, 1, H, W), f32)
    zero_ch = jnp.zeros((B, Cpad - Cin_tot - 1, H, W), f32)
    comb = jnp.concatenate(
        [x_nchw.astype(f32), h_nchw.astype(f32), ones_ch, zero_ch], axis=1)
    comb = jnp.pad(comb, ((0, 0), (0, 0), (pad, pad), (pad, pad)))  # (B,Cpad,Hp,Wp)
    comb = jnp.transpose(comb, (1, 0, 2, 3)).reshape(Cpad, N)       # batch-stacked
    comb = jnp.pad(comb, ((0, 0), (0, L_flat - N))).astype(bf16)

    # ---- cell state in the same stacked/flattened column layout (junk cols = 0).
    c_lay = jnp.pad(c_nchw.astype(f32),
                    ((0, 0), (0, 0), (0, Hp - H), (0, Wp - W)))
    c_lay = jnp.transpose(c_lay, (1, 0, 2, 3)).reshape(Chid, N)

    # ---- weights: (O, Cin_tot, K, K) -> (K*K, O, Cpad), bias folded into the
    #      centre tap's "ones" channel column. (Hoist out of any recurrent loop.)
    w_t = jnp.transpose(weight_oihw.astype(f32), (2, 3, 0, 1))      # (K,K,O,Cin_tot)
    w_t = jnp.pad(w_t, ((0, 0), (0, 0), (0, 0), (0, Cpad - Cin_tot)))
    w_t = w_t.at[pad, pad, :, Cin_tot].set(bias.astype(f32))
    w_fold = w_t.reshape(K * K, 4 * Chid, Cpad).astype(bf16)

    kernel = functools.partial(convlstm_cell_kernel, K=K, Wp=Wp, N=N, Chid=Chid)

    grid_spec = pltpu.PrefetchScalarGridSpec(
        num_scalar_prefetch=0,
        grid=(1,),                                    # everything in one step
        in_specs=[
            pl.BlockSpec((Cpad, L_flat), lambda i: (0, 0)),
            pl.BlockSpec((K * K, 4 * Chid, Cpad), lambda i: (0, 0, 0)),
            pl.BlockSpec((Chid, N), lambda i: (0, 0)),
        ],
        out_specs=(
            pl.BlockSpec((Chid, N), lambda i: (0, 0)),
            pl.BlockSpec((Chid, N), lambda i: (0, 0)),
        ),
    )

    h_flat, c_flat = pl.pallas_call(
        kernel,
        out_shape=(jax.ShapeDtypeStruct((Chid, N), f32),
                   jax.ShapeDtypeStruct((Chid, N), f32)),
        grid_spec=grid_spec,
        compiler_params=pltpu.CompilerParams(
            dimension_semantics=("arbitrary",),
            vmem_limit_bytes=32 * 1024 * 1024,        # working set << 1 MiB
        ),
    )(comb, w_fold, c_lay)

    # Drop the junk halo rows / padded-width columns and restore NCHW.
    h_next = jnp.transpose(h_flat.reshape(Chid, B, Hp, Wp),
                           (1, 0, 2, 3))[:, :, :H, :W]
    c_next = jnp.transpose(c_flat.reshape(Chid, B, Hp, Wp),
                           (1, 0, 2, 3))[:, :, :H, :W]
    return h_next, c_next


def convlstm_cell_reference(x, h, c, weight_oihw, bias):
    """Pure-JAX reference (mirrors the PyTorch module exactly, NCHW, f32)."""
    K = weight_oihw.shape[-1]
    pad = K // 2
    comb = jnp.concatenate([x, h], axis=1)
    out = lax.conv_general_dilated(
        comb, weight_oihw, window_strides=(1, 1),
        padding=[(pad, pad), (pad, pad)],
        dimension_numbers=('NCHW', 'OIHW', 'NCHW'))
    out = out + bias[None, :, None, None]
    cc_i, cc_f, cc_o, cc_g = jnp.split(out, 4, axis=1)
    i = jax.nn.sigmoid(cc_i)
    f = jax.nn.sigmoid(cc_f)
    o = jax.nn.sigmoid(cc_o)
    g = jnp.tanh(cc_g)
    c_next = f * c + i * g
    h_next = o * jnp.tanh(c_next)
    return h_next, c_next


if __name__ == "__main__":
    # Module config (synthetic, deterministic init).
    B, input_dim, hidden_dim, H, W, K = 2, 4, 8, 16, 16, 3

    key = jax.random.PRNGKey(0)
    kx, kh, kc, kw, kb = jax.random.split(key, 5)

    x = jax.random.normal(kx, (B, input_dim, H, W), dtype=jnp.float32)
    h_cur = jax.random.normal(kh, (B, hidden_dim, H, W), dtype=jnp.float32)
    c_cur = jax.random.normal(kc, (B, hidden_dim, H, W), dtype=jnp.float32)

    # nn.Conv2d(input_dim+hidden_dim, 4*hidden_dim, K, padding=K//2, bias=True)
    fan_in = (input_dim + hidden_dim) * K * K
    bound = 1.0 / np.sqrt(fan_in)
    weight = jax.random.uniform(
        kw, (4 * hidden_dim, input_dim + hidden_dim, K, K),
        minval=-bound, maxval=bound, dtype=jnp.float32)
    bias = jax.random.uniform(
        kb, (4 * hidden_dim,), minval=-bound, maxval=bound, dtype=jnp.float32)

    h_next, c_next = convlstm_cell_forward(x, h_cur, c_cur, weight, bias)
    jax.block_until_ready((h_next, c_next))

    h_ref, c_ref = convlstm_cell_reference(x, h_cur, c_cur, weight, bias)
    # bf16 MXU operands -> loosened tolerances (gating itself is f32).
    np.testing.assert_allclose(np.asarray(h_next), np.asarray(h_ref),
                               rtol=2e-2, atol=2e-2)
    np.testing.assert_allclose(np.asarray(c_next), np.asarray(c_ref),
                               rtol=2e-2, atol=2e-2)

    assert h_next.shape == (B, hidden_dim, H, W)
    assert c_next.shape == (B, hidden_dim, H, W)

    print("KERNEL_OK")
</pallas_src>

<mosaic_0001>
module attributes {stable_mosaic.version = 11 : i64} {
  func.func @convlstm_cell_kernel(%arg0: i32, %arg1: memref<16x768xbf16, #tpu.memory_space<vmem>>, %arg2: memref<9x32x16xbf16, #tpu.memory_space<vmem>>, %arg3: memref<8x648xf32, #tpu.memory_space<vmem>>, %arg4: memref<8x648xf32, #tpu.memory_space<vmem>>, %arg5: memref<8x648xf32, #tpu.memory_space<vmem>>) attributes {dimension_semantics = [#tpu.dimension_semantics<arbitrary>], iteration_bounds = array<i64: 1>, scalar_prefetch = 0 : i64, scratch_operands = 0 : i64, tpu.core_type = #tpu.core_type<tc>, window_params = [{pipeline_mode = #tpu.pipeline_mode<synchronous>, transform_indices = @transform_0, window_bounds = array<i64: 16, 768>}, {pipeline_mode = #tpu.pipeline_mode<synchronous>, transform_indices = @transform_1, window_bounds = array<i64: 9, 32, 16>}, {pipeline_mode = #tpu.pipeline_mode<synchronous>, transform_indices = @transform_2, window_bounds = array<i64: 8, 648>}, {pipeline_mode = #tpu.pipeline_mode<synchronous>, transform_indices = @transform_3, window_bounds = array<i64: 8, 648>}, {pipeline_mode = #tpu.pipeline_mode<synchronous>, transform_indices = @transform_4, window_bounds = array<i64: 8, 648>}]} {
    %c0 = arith.constant 0 : index
    %c0_0 = arith.constant 0 : index
    %0 = vector.load %arg1[%c0, %c0_0] : memref<16x768xbf16, #tpu.memory_space<vmem>>, vector<16x648xbf16>
    %c0_1 = arith.constant 0 : index
    %c0_2 = arith.constant 0 : index
    %c0_3 = arith.constant 0 : index
    %1 = vector.load %arg2[%c0_1, %c0_2, %c0_3] : memref<9x32x16xbf16, #tpu.memory_space<vmem>>, vector<1x32x16xbf16>
    %2 = vector.shape_cast %1 : vector<1x32x16xbf16> to vector<32x16xbf16>
    %cst = arith.constant dense<0.000000e+00> : vector<32x648xf32>
    %3 = tpu.matmul %2, %0, %cst {dimension_numbers = #tpu.dot_dimension_numbers<[1], [0], [0], [1], [0, 0, 1, 1], [], []>} : vector<32x16xbf16>, vector<16x648xbf16>, vector<32x648xf32> -> vector<32x648xf32>
    %c0_4 = arith.constant 0 : index
    %c1 = arith.constant 1 : index
    %4 = vector.load %arg1[%c0_4, %c1] : memref<16x768xbf16, #tpu.memory_space<vmem>>, vector<16x648xbf16>
    %c1_5 = arith.constant 1 : index
    %c0_6 = arith.constant 0 : index
    %c0_7 = arith.constant 0 : index
    %5 = vector.load %arg2[%c1_5, %c0_6, %c0_7] : memref<9x32x16xbf16, #tpu.memory_space<vmem>>, vector<1x32x16xbf16>
    %6 = vector.shape_cast %5 : vector<1x32x16xbf16> to vector<32x16xbf16>
    %cst_8 = arith.constant dense<0.000000e+00> : vector<32x648xf32>
    %7 = tpu.matmul %6, %4, %cst_8 {dimension_numbers = #tpu.dot_dimension_numbers<[1], [0], [0], [1], [0, 0, 1, 1], [], []>} : vector<32x16xbf16>, vector<16x648xbf16>, vector<32x648xf32> -> vector<32x648xf32>
    %8 = arith.addf %3, %7 : vector<32x648xf32>
    %c0_9 = arith.constant 0 : index
    %c2 = arith.constant 2 : index
    %9 = vector.load %arg1[%c0_9, %c2] : memref<16x768xbf16, #tpu.memory_space<vmem>>, vector<16x648xbf16>
    %c2_10 = arith.constant 2 : index
    %c0_11 = arith.constant 0 : index
    %c0_12 = arith.constant 0 : index
    %10 = vector.load %arg2[%c2_10, %c0_11, %c0_12] : memref<9x32x16xbf16, #tpu.memory_space<vmem>>, vector<1x32x16xbf16>
    %11 = vector.shape_cast %10 : vector<1x32x16xbf16> to vector<32x16xbf16>
    %cst_13 = arith.constant dense<0.000000e+00> : vector<32x648xf32>
    %12 = tpu.matmul %11, %9, %cst_13 {dimension_numbers = #tpu.dot_dimension_numbers<[1], [0], [0], [1], [0, 0, 1, 1], [], []>} : vector<32x16xbf16>, vector<16x648xbf16>, vector<32x648xf32> -> vector<32x648xf32>
    %13 = arith.addf %8, %12 : vector<32x648xf32>
    %c0_14 = arith.constant 0 : index
    %c18 = arith.constant 18 : index
    %14 = vector.load %arg1[%c0_14, %c18] : memref<16x768xbf16, #tpu.memory_space<vmem>>, vector<16x648xbf16>
    %c3 = arith.constant 3 : index
    %c0_15 = arith.constant 0 : index
    %c0_16 = arith.constant 0 : index
    %15 = vector.load %arg2[%c3, %c0_15, %c0_16] : memref<9x32x16xbf16, #tpu.memory_space<vmem>>, vector<1x32x16xbf16>
    %16 = vector.shape_cast %15 : vector<1x32x16xbf16> to vector<32x16xbf16>
    %cst_17 = arith.constant dense<0.000000e+00> : vector<32x648xf32>
    %17 = tpu.matmul %16, %14, %cst_17 {dimension_numbers = #tpu.dot_dimension_numbers<[1], [0], [0], [1], [0, 0, 1, 1], [], []>} : vector<32x16xbf16>, vector<16x648xbf16>, vector<32x648xf32> -> vector<32x648xf32>
    %18 = arith.addf %13, %17 : vector<32x648xf32>
    %c0_18 = arith.constant 0 : index
    %c19 = arith.constant 19 : index
    %19 = vector.load %arg1[%c0_18, %c19] : memref<16x768xbf16, #tpu.memory_space<vmem>>, vector<16x648xbf16>
    %c4 = arith.constant 4 : index
    %c0_19 = arith.constant 0 : index
    %c0_20 = arith.constant 0 : index
    %20 = vector.load %arg2[%c4, %c0_19, %c0_20] : memref<9x32x16xbf16, #tpu.memory_space<vmem>>, vector<1x32x16xbf16>
    %21 = vector.shape_cast %20 : vector<1x32x16xbf16> to vector<32x16xbf16>
    %cst_21 = arith.constant dense<0.000000e+00> : vector<32x648xf32>
    %22 = tpu.matmul %21, %19, %cst_21 {dimension_numbers = #tpu.dot_dimension_numbers<[1], [0], [0], [1], [0, 0, 1, 1], [], []>} : vector<32x16xbf16>, vector<16x648xbf16>, vector<32x648xf32> -> vector<32x648xf32>
    %23 = arith.addf %18, %22 : vector<32x648xf32>
    %c0_22 = arith.constant 0 : index
    %c20 = arith.constant 20 : index
    %24 = vector.load %arg1[%c0_22, %c20] : memref<16x768xbf16, #tpu.memory_space<vmem>>, vector<16x648xbf16>
    %c5 = arith.constant 5 : index
    %c0_23 = arith.constant 0 : index
    %c0_24 = arith.constant 0 : index
    %25 = vector.load %arg2[%c5, %c0_23, %c0_24] : memref<9x32x16xbf16, #tpu.memory_space<vmem>>, vector<1x32x16xbf16>
    %26 = vector.shape_cast %25 : vector<1x32x16xbf16> to vector<32x16xbf16>
    %cst_25 = arith.constant dense<0.000000e+00> : vector<32x648xf32>
    %27 = tpu.matmul %26, %24, %cst_25 {dimension_numbers = #tpu.dot_dimension_numbers<[1], [0], [0], [1], [0, 0, 1, 1], [], []>} : vector<32x16xbf16>, vector<16x648xbf16>, vector<32x648xf32> -> vector<32x648xf32>
    %28 = arith.addf %23, %27 : vector<32x648xf32>
    %c0_26 = arith.constant 0 : index
    %c36 = arith.constant 36 : index
    %29 = vector.load %arg1[%c0_26, %c36] : memref<16x768xbf16, #tpu.memory_space<vmem>>, vector<16x648xbf16>
    %c6 = arith.constant 6 : index
    %c0_27 = arith.constant 0 : index
    %c0_28 = arith.constant 0 : index
    %30 = vector.load %arg2[%c6, %c0_27, %c0_28] : memref<9x32x16xbf16, #tpu.memory_space<vmem>>, vector<1x32x16xbf16>
    %31 = vector.shape_cast %30 : vector<1x32x16xbf16> to vector<32x16xbf16>
    %cst_29 = arith.constant dense<0.000000e+00> : vector<32x648xf32>
    %32 = tpu.matmul %31, %29, %cst_29 {dimension_numbers = #tpu.dot_dimension_numbers<[1], [0], [0], [1], [0, 0, 1, 1], [], []>} : vector<32x16xbf16>, vector<16x648xbf16>, vector<32x648xf32> -> vector<32x648xf32>
    %33 = arith.addf %28, %32 : vector<32x648xf32>
    %c0_30 = arith.constant 0 : index
    %c37 = arith.constant 37 : index
    %34 = vector.load %arg1[%c0_30, %c37] : memref<16x768xbf16, #tpu.memory_space<vmem>>, vector<16x648xbf16>
    %c7 = arith.constant 7 : index
    %c0_31 = arith.constant 0 : index
    %c0_32 = arith.constant 0 : index
    %35 = vector.load %arg2[%c7, %c0_31, %c0_32] : memref<9x32x16xbf16, #tpu.memory_space<vmem>>, vector<1x32x16xbf16>
    %36 = vector.shape_cast %35 : vector<1x32x16xbf16> to vector<32x16xbf16>
    %cst_33 = arith.constant dense<0.000000e+00> : vector<32x648xf32>
    %37 = tpu.matmul %36, %34, %cst_33 {dimension_numbers = #tpu.dot_dimension_numbers<[1], [0], [0], [1], [0, 0, 1, 1], [], []>} : vector<32x16xbf16>, vector<16x648xbf16>, vector<32x648xf32> -> vector<32x648xf32>
    %38 = arith.addf %33, %37 : vector<32x648xf32>
    %c0_34 = arith.constant 0 : index
    %c38 = arith.constant 38 : index
    %39 = vector.load %arg1[%c0_34, %c38] : memref<16x768xbf16, #tpu.memory_space<vmem>>, vector<16x648xbf16>
    %c8 = arith.constant 8 : index
    %c0_35 = arith.constant 0 : index
    %c0_36 = arith.constant 0 : index
    %40 = vector.load %arg2[%c8, %c0_35, %c0_36] : memref<9x32x16xbf16, #tpu.memory_space<vmem>>, vector<1x32x16xbf16>
    %41 = vector.shape_cast %40 : vector<1x32x16xbf16> to vector<32x16xbf16>
    %cst_37 = arith.constant dense<0.000000e+00> : vector<32x648xf32>
    %42 = tpu.matmul %41, %39, %cst_37 {dimension_numbers = #tpu.dot_dimension_numbers<[1], [0], [0], [1], [0, 0, 1, 1], [], []>} : vector<32x16xbf16>, vector<16x648xbf16>, vector<32x648xf32> -> vector<32x648xf32>
    %43 = arith.addf %38, %42 : vector<32x648xf32>
    %44 = vector.extract_strided_slice %43 {offsets = [0, 0], sizes = [8, 648], strides = [1, 1]} : vector<32x648xf32> to vector<8x648xf32>
    %45 = vector.extract_strided_slice %43 {offsets = [8, 0], sizes = [8, 648], strides = [1, 1]} : vector<32x648xf32> to vector<8x648xf32>
    %46 = vector.extract_strided_slice %43 {offsets = [16, 0], sizes = [8, 648], strides = [1, 1]} : vector<32x648xf32> to vector<8x648xf32>
    %47 = vector.extract_strided_slice %43 {offsets = [24, 0], sizes = [8, 648], strides = [1, 1]} : vector<32x648xf32> to vector<8x648xf32>
    %cst_38 = arith.constant 5.000000e-01 : f32
    %48 = vector.broadcast %cst_38 : f32 to vector<8x648xf32>
    %49 = arith.mulf %48, %44 : vector<8x648xf32>
    %50 = math.tanh %49 : vector<8x648xf32>
    %cst_39 = arith.constant 5.000000e-01 : f32
    %51 = vector.broadcast %cst_39 : f32 to vector<8x648xf32>
    %52 = arith.mulf %51, %50 : vector<8x648xf32>
    %cst_40 = arith.constant 5.000000e-01 : f32
    %53 = vector.broadcast %cst_40 : f32 to vector<8x648xf32>
    %54 = arith.addf %52, %53 : vector<8x648xf32>
    %cst_41 = arith.constant 5.000000e-01 : f32
    %55 = vector.broadcast %cst_41 : f32 to vector<8x648xf32>
    %56 = arith.mulf %55, %45 : vector<8x648xf32>
    %57 = math.tanh %56 : vector<8x648xf32>
    %cst_42 = arith.constant 5.000000e-01 : f32
    %58 = vector.broadcast %cst_42 : f32 to vector<8x648xf32>
    %59 = arith.mulf %58, %57 : vector<8x648xf32>
    %cst_43 = arith.constant 5.000000e-01 : f32
    %60 = vector.broadcast %cst_43 : f32 to vector<8x648xf32>
    %61 = arith.addf %59, %60 : vector<8x648xf32>
    %cst_44 = arith.constant 5.000000e-01 : f32
    %62 = vector.broadcast %cst_44 : f32 to vector<8x648xf32>
    %63 = arith.mulf %62, %46 : vector<8x648xf32>
    %64 = math.tanh %63 : vector<8x648xf32>
    %cst_45 = arith.constant 5.000000e-01 : f32
    %65 = vector.broadcast %cst_45 : f32 to vector<8x648xf32>
    %66 = arith.mulf %65, %64 : vector<8x648xf32>
    %cst_46 = arith.constant 5.000000e-01 : f32
    %67 = vector.broadcast %cst_46 : f32 to vector<8x648xf32>
    %68 = arith.addf %66, %67 : vector<8x648xf32>
    %69 = math.tanh %47 : vector<8x648xf32>
    %c0_47 = arith.constant 0 : index
    %c0_48 = arith.constant 0 : index
    %70 = vector.load %arg3[%c0_47, %c0_48] : memref<8x648xf32, #tpu.memory_space<vmem>>, vector<8x648xf32>
    %71 = arith.mulf %61, %70 : vector<8x648xf32>
    %72 = arith.mulf %54, %69 : vector<8x648xf32>
    %73 = arith.addf %71, %72 : vector<8x648xf32>
    %74 = math.tanh %73 : vector<8x648xf32>
    %75 = arith.mulf %68, %74 : vector<8x648xf32>
    %c0_49 = arith.constant 0 : index
    %c0_50 = arith.constant 0 : index
    %76 = vector.load %arg5[%c0_49, %c0_50] : memref<8x648xf32, #tpu.memory_space<vmem>>, vector<8x648xf32>
    tpu.vector_store %arg5[%c0_49, %c0_50], %73 {strides = array<i32>} : memref<8x648xf32, #tpu.memory_space<vmem>>, vector<8x648xf32>,
    %c0_51 = arith.constant 0 : index
    %c0_52 = arith.constant 0 : index
    %77 = vector.load %arg4[%c0_51, %c0_52] : memref<8x648xf32, #tpu.memory_space<vmem>>, vector<8x648xf32>
    tpu.vector_store %arg4[%c0_51, %c0_52], %75 {strides = array<i32>} : memref<8x648xf32, #tpu.memory_space<vmem>>, vector<8x648xf32>,
    return
  }
  func.func @transform_0(%arg0: i32) -> (i32, i32) {
    %c0_i32 = arith.constant 0 : i32
    %c0_i32_0 = arith.constant 0 : i32
    %c0_i32_1 = arith.constant 0 : i32
    return %c0_i32, %c0_i32_0 : i32, i32
  }
  func.func @transform_1(%arg0: i32) -> (i32, i32, i32) {
    %c0_i32 = arith.constant 0 : i32
    %c0_i32_0 = arith.constant 0 : i32
    %c0_i32_1 = arith.constant 0 : i32
    %c0_i32_2 = arith.constant 0 : i32
    return %c0_i32, %c0_i32_0, %c0_i32_1 : i32, i32, i32
  }
  func.func @transform_2(%arg0: i32) -> (i32, i32) {
    %c0_i32 = arith.constant 0 : i32
    %c0_i32_0 = arith.constant 0 : i32
    %c0_i32_1 = arith.constant 0 : i32
    return %c0_i32, %c0_i32_0 : i32, i32
  }
  func.func @transform_3(%arg0: i32) -> (i32, i32) {
    %c0_i32 = arith.constant 0 : i32
    %c0_i32_0 = arith.constant 0 : i32
    %c0_i32_1 = arith.constant 0 : i32
    return %c0_i32, %c0_i32_0 : i32, i32
  }
  func.func @transform_4(%arg0: i32) -> (i32, i32) {
    %c0_i32 = arith.constant 0 : i32
    %c0_i32_0 = arith.constant 0 : i32
    %c0_i32_1 = arith.constant 0 : i32
    return %c0_i32, %c0_i32_0 : i32, i32
  }
}

</mosaic_0001>

<bundles_post_ra>
// kernel: tpu_custom_call.1
= control target key start
LH: loop header
LB: loop body
LE: loop exit
PB: predicated region body
PF: predicated region fallthrough
CT: control target
= control target key end

     0   :  { %10 = vsyncpa [#allocation3], 0  ;;  %s2444_s19 = smov 127   ;;  %v2445_v5 = vmov 0   ;;  %s2446_s28 = smov 126   ;;  %s3095_s0 = inlined_call_operand.vmem [shape: bf16[16,768], index: 0, kind: input, shape index: {}]   ;;  %s3096_s1 = inlined_call_operand.vmem [shape: bf16[9,32,16], index: 1, kind: input, shape index: {}]   ;;  %s3097_s2 = inlined_call_operand.vmem [shape: f32[8,648], index: 2, kind: input, shape index: {}]   ;;  %s3098_s3 = inlined_call_operand.hbm [shape: f32[8,648], index: 3, kind: output, shape index: {0}]   ;;  %s3099_s4 = inlined_call_operand.hbm [shape: f32[8,648], index: 4, kind: output, shape index: {1}]  }
   0x1   :  { %v2483_v0 = vld [vmem:[%s3095_s0 + $0x4] ss:$24 sps:$4 sm:$0xff]   ;;  %v2488_v1 = vld [vmem:[%s3095_s0] ss:$24 sps:$4 sm:$0xff]   ;;  %v2505_v4 = vld [vmem:[%s3095_s0 + $0x10] ss:$24 sps:$4 sm:$0xff]   ;;  %131 = vmatprep.mubr.bf16.mxu0 %v2445_v5  ;;  %141 = vmatprep.mubr.bf16.mxu1 %v2445_v5 }
   0x2   :  { %70 = vrot.lane.b32.xlu0 %v2483_v0, %s2444_s19  ;;  %v2494_v2 = vld [vmem:[%s3095_s0 + $0x8] ss:$24 sps:$4 sm:$0xff]   ;;  %68 = vrot.lane.b32.xlu1 %v2488_v1, %s2444_s19  ;;  %v2500_v3 = vld [vmem:[%s3095_s0 + $0xc] ss:$24 sps:$4 sm:$0xff]  }
   0x3   :  { %v2513_v6 = vld [vmem:[%s3095_s0 + $0x14] ss:$24 sps:$4 sm:$0xff]  }
   0x6   :  { %72 = vrot.lane.b32.xlu0 %v2494_v2, %s2444_s19  ;;  %74 = vrot.lane.b32.xlu1 %v2500_v3, %s2444_s19 }
   0xa   :  { %76 = vrot.lane.b32.xlu0 %v2505_v4, %s2444_s19  ;;  %78 = vrot.lane.b32.xlu1 %v2513_v6, %s2444_s19 }
   0xe   :  { %456 = vrot.lane.b32.xlu0 %v2483_v0, %s2446_s28  ;;  %458 = vrot.lane.b32.xlu1 %v2494_v2, %s2446_s28 }
   0xf   :  { %11 = vsyncpa [#allocation5], 0  ;;  %s2447_s0 = smov 110   ;;  %s2448_s29 = smov 109   ;;  %vm80_vm0 = vcmask 1039360   ;;  %v2322_v13 = vld [vmem:[%s3096_s1 + $0x10] sm:$0xff]  }
  0x10   :  { %s2449_s30 = smov 108   ;;  %s2450_s5 = smov 92   ;;  %v2323_v14 = vld [vmem:[%s3096_s1 + $0x18] sm:$0xff]   ;;  %vm92_vm1 = vcmask 130048   ;;  %vm466_vm2 = vcmask 1031168   ;;  %v2324_v25 = vld [vmem:[%s3096_s1] sm:$0xff]  }
  0x11   :  { %s2451_s6 = smov 91   ;;  %s2452_s7 = smov 90   ;;  %v2325_v30 = vld [vmem:[%s3096_s1 + $0x8] sm:$0xff]   ;;  %v2326_v33 = vld [vmem:[%s3096_s1 + $0x20] sm:$0xff]   ;;  %vm694_vm3 = vcmask 900096   ;;  %vm922_vm4 = vcmask 891904  }
  0x12   :  { %454 = vrot.lane.b32.xlu0 %v2488_v1, %s2446_s28  ;;  %460 = vrot.lane.b32.xlu1 %v2500_v3, %s2446_s28  ;;  %v2327_v40 = vld [vmem:[%s3096_s1 + $0x28] sm:$0xff]   ;;  %v2328_v50 = vld [vmem:[%s3096_s1 + $0x30] sm:$0xff]   ;;  %vm1150_vm5 = vcmask 883712   ;;  %vm1378_vm6 = vcmask 752640   ;;  %vm1606_vm7 = vcmask 744448   ;;  %vm1834_vm8 = vcmask 736256  }
  0x13   :  { %v2329_v56 = vld [vmem:[%s3096_s1 + $0x38] sm:$0xff]   ;;  %v2330_v59 = vld [vmem:[%s3096_s1 + $0x40] sm:$0xff]   ;;  %vm2154_vm9 = vcmask 64512  }
  0x16   :  { %462 = vrot.lane.b32.xlu0 %v2505_v4, %s2446_s28  ;;  %464 = vrot.lane.b32.xlu1 %v2513_v6, %s2446_s28  ;;  %s2453_s28 = smov [#allocation4]  }
  0x1a   :  { %684 = vrot.lane.b32.xlu0 %v2483_v0, %s2447_s0  ;;  %686 = vrot.lane.b32.xlu1 %v2494_v2, %s2447_s0 }
  0x1e   :  { %688 = vrot.lane.b32.xlu0 %v2500_v3, %s2447_s0  ;;  %690 = vrot.lane.b32.xlu1 %v2505_v4, %s2447_s0 }
  0x22   :  { %682 = vrot.lane.b32.xlu0 %v2488_v1, %s2447_s0  ;;  %912 = vrot.lane.b32.xlu1 %v2483_v0, %s2448_s29 }
  0x26   :  { %914 = vrot.lane.b32.xlu0 %v2494_v2, %s2448_s29  ;;  %692 = vrot.lane.b32.xlu1 %v2513_v6, %s2447_s0  ;;  %s2178_s0 = sshll.u32 %s2453_s28, 4  ;;  %s2179_s0 = int_to_ptr.vmem [resolvable:$true] %s2178_s0 }
  0x27   :  { %p2405_p1 = scmp.lt.s32.totalorder %s2179_s0, %s2179_s0 }
  0x2a   :  { %910 = vrot.lane.b32.xlu0 %v2488_v1, %s2448_s29  ;;  %916 = vrot.lane.b32.xlu1 %v2500_v3, %s2448_s29 }
  0x2e   :  { %918 = vrot.lane.b32.xlu0 %v2505_v4, %s2448_s29  ;;  %920 = vrot.lane.b32.xlu1 %v2513_v6, %s2448_s29 }
  0x32   :  { %1140 = vrot.lane.b32.xlu0 %v2483_v0, %s2449_s30  ;;  %1142 = vrot.lane.b32.xlu1 %v2494_v2, %s2449_s30 }
  0x36   :  { %1144 = vrot.lane.b32.xlu0 %v2500_v3, %s2449_s30  ;;  %1146 = vrot.lane.b32.xlu1 %v2505_v4, %s2449_s30 }
  0x3a   :  { %1138 = vrot.lane.b32.xlu0 %v2488_v1, %s2449_s30  ;;  %1368 = vrot.lane.b32.xlu1 %v2483_v0, %s2450_s5 }
  0x3e   :  { %1370 = vrot.lane.b32.xlu0 %v2494_v2, %s2450_s5  ;;  %1148 = vrot.lane.b32.xlu1 %v2513_v6, %s2449_s30 }
  0x42   :  { %1366 = vrot.lane.b32.xlu0 %v2488_v1, %s2450_s5  ;;  %1372 = vrot.lane.b32.xlu1 %v2500_v3, %s2450_s5 }
  0x46   :  { %1374 = vrot.lane.b32.xlu0 %v2505_v4, %s2450_s5  ;;  %1376 = vrot.lane.b32.xlu1 %v2513_v6, %s2450_s5 }
  0x4a   :  { %1596 = vrot.lane.b32.xlu0 %v2483_v0, %s2451_s6  ;;  %1598 = vrot.lane.b32.xlu1 %v2494_v2, %s2451_s6 }
  0x4e   :  { %1600 = vrot.lane.b32.xlu0 %v2500_v3, %s2451_s6  ;;  %1602 = vrot.lane.b32.xlu1 %v2505_v4, %s2451_s6 }
  0x52   :  { %1594 = vrot.lane.b32.xlu0 %v2488_v1, %s2451_s6  ;;  %1824 = vrot.lane.b32.xlu1 %v2483_v0, %s2452_s7 }
  0x56   :  { %1826 = vrot.lane.b32.xlu0 %v2494_v2, %s2452_s7  ;;  %1604 = vrot.lane.b32.xlu1 %v2513_v6, %s2451_s6 }
  0x5a   :  { %1822 = vrot.lane.b32.xlu0 %v2488_v1, %s2452_s7  ;;  %1828 = vrot.lane.b32.xlu1 %v2500_v3, %s2452_s7 }
  0x5e   :  { %1830 = vrot.lane.b32.xlu0 %v2505_v4, %s2452_s7  ;;  %1832 = vrot.lane.b32.xlu1 %v2513_v6, %s2452_s7 }
  0x74   :  { %v71_v7 = vpop.permute.xlu0 %70  ;;  %v69_v8 = vpop.permute.xlu1 %68 }
  0x75   :  { %v81_v12 = vsel %vm80_vm0, %v69_v8, %v71_v7 }
  0x78   :  { %v73_v9 = vpop.permute.xlu0 %72  ;;  %v75_v10 = vpop.permute.xlu1 %74 }
  0x79   :  { %v82_v11 = vsel %vm80_vm0, %v71_v7, %v73_v9  ;;  %v83_v19 = vsel %vm80_vm0, %v73_v9, %v75_v10 }
  0x7a   :  { %113 = vmatprep.subr.bf16.mxu0 %v82_v11  ;;  %2300 = vmatprep.subr.bf16.mxu1 %v82_v11 }
  0x7b   :  { %114 = vmatpush1.bf16.msra.mxu0 %v81_v12  ;;  %2301 = vmatpush1.bf16.msra.mxu1 %v81_v12 }
  0x7c   :  { %v77_v15 = vpop.permute.xlu0 %76  ;;  %v79_v16 = vpop.permute.xlu1 %78 }
  0x7d   :  { %v84_v17 = vsel %vm80_vm0, %v75_v10, %v77_v15  ;;  %v85_v18 = vsel %vm80_vm0, %v77_v15, %v79_v16  ;;  %219 = vmatprep.subr.bf16.mxu0 %v79_v16 }
  0x7e   :  { %2202 = vmatmul.mubr.msk.bf16.vlgmr.msra.gmra.mxu0 %vm92_vm1, %v2322_v13  ;;  %2203 = vmatmul.mubr.msk.bf16.vlgmr.msra.gmra.mxu1 %vm92_vm1, %v2323_v14 }
  0x7f   :  { %166 = vmatprep.subr.bf16.mxu1 %v84_v17  ;;  %220 = vmatpush1.bf16.msra.mxu0 %v85_v18 }
  0x80   :  { %167 = vmatpush1.bf16.msra.mxu1 %v83_v19  ;;  %184 = vmatprep.mubr.bf16.mxu1 %v2445_v5  ;;  %v459_v20 = vpop.permute.xlu1 %458  ;;  %v457_v21 = vpop.permute.xlu0 %456  ;;  %v2333_v19 = vld [vmem:[%s3096_s1 + $0x58] sm:$0xff]  }
  0x81   :  { %237 = vmatprep.mubr.bf16.mxu0 %v2445_v5  ;;  %294 = vmatprep.subr.bf16.mxu1 %v2483_v0  ;;  %v468_v22 = vsel %vm466_vm2, %v457_v21, %v459_v20 }
  0x82   :  { %347 = vmatprep.subr.bf16.mxu0 %v2500_v3 }
  0x84   :  { %v455_v23 = vpop.permute.xlu0 %454  ;;  %v461_v24 = vpop.permute.xlu1 %460 }
  0x85   :  { %v467_v27 = vsel %vm466_vm2, %v455_v23, %v457_v21  ;;  %v469_v37 = vsel %vm466_vm2, %v459_v20, %v461_v24 }
  0x86   :  { %2204 = vmatmul.mubr.msk.bf16.vlgmr.msra.gmra.mxu1 %vm92_vm1, %v2322_v13  ;;  %2206 = vmatmul.mubr.msk.bf16.vlgmr.msra.gmra.mxu0 %vm92_vm1, %v2322_v13  ;;  %v2332_v13 = vld [vmem:[%s3096_s1 + $0x50] sm:$0xff]  }
  0x87   :  { %295 = vmatpush1.bf16.msra.mxu1 %v2488_v1  ;;  %348 = vmatpush1.bf16.msra.mxu0 %v2494_v2  ;;  %v2331_v2 = vld [vmem:[%s3096_s1 + $0x48] sm:$0xff]  }
  0x88   :  { %194 = vmatprep.mubr.bf16.mxu1 %v2445_v5  ;;  %247 = vmatprep.mubr.bf16.mxu0 %v2445_v5  ;;  %v463_v26 = vpop.permute.xlu0 %462  ;;  %v465_v29 = vpop.permute.xlu1 %464 }
  0x89   :  { %498 = vmatprep.subr.bf16.mxu0 %v468_v22  ;;  %400 = vmatprep.subr.bf16.mxu1 %v2513_v6  ;;  %v470_v28 = vsel %vm466_vm2, %v461_v24, %v463_v26  ;;  %v471_v34 = vsel %vm466_vm2, %v463_v26, %v465_v29  ;;  %v2334_v22 = vld [vmem:[%s3096_s1 + $0x60] sm:$0xff]  }
  0x8c   :  { %v685_v31 = vpop.permute.xlu0 %684  ;;  %v687_v32 = vpop.permute.xlu1 %686 }
  0x8d   :  { %v696_v38 = vsel %vm694_vm3, %v685_v31, %v687_v32 }
  0x8e   :  { %2205 = vmatmul.mubr.msk.bf16.gmra.mxu1 %vm92_vm1, %v2323_v14  ;;  %2207 = vmatmul.mubr.msk.bf16.gmra.mxu0 %vm92_vm1, %v2323_v14 }
  0x8f   :  { %312 = vmatprep.mubr.bf16.mxu1 %v2445_v5  ;;  %365 = vmatprep.mubr.bf16.mxu0 %v2445_v5 }
  0x90   :  { %v689_v35 = vpop.permute.xlu0 %688  ;;  %v691_v36 = vpop.permute.xlu1 %690 }
  0x91   :  { %v698_v39 = vsel %vm694_vm3, %v689_v35, %v691_v36  ;;  %v697_v43 = vsel %vm694_vm3, %v687_v32, %v689_v35 }
  0x94   :  { %v683_v41 = vpop.permute.xlu0 %682  ;;  %v913_v42 = vpop.permute.xlu1 %912 }
  0x95   :  { %v695_v44 = vsel %vm694_vm3, %v683_v41, %v685_v31 }
  0x96   :  { %2210 = vmatmul.mubr.msk.bf16.vlgmr.msra.gmra.mxu1 %vm92_vm1, %v2324_v25  ;;  %2212 = vmatmul.mubr.msk.bf16.vlgmr.msra.gmra.mxu0 %vm92_vm1, %v2324_v25 }
  0x97   :  { %499 = vmatpush1.bf16.msra.mxu0 %v467_v27  ;;  %401 = vmatpush1.bf16.msra.mxu1 %v2505_v4 }
  0x98   :  { %322 = vmatprep.mubr.bf16.mxu1 %v2445_v5  ;;  %375 = vmatprep.mubr.bf16.mxu0 %v2445_v5  ;;  %v915_v45 = vpop.permute.xlu0 %914  ;;  %v693_v47 = vpop.permute.xlu1 %692 }
  0x99   :  { %551 = vmatprep.subr.bf16.mxu1 %v470_v28  ;;  %604 = vmatprep.subr.bf16.mxu0 %v465_v29  ;;  %v924_v46 = vsel %vm922_vm4, %v913_v42, %v915_v45  ;;  %v699_v53 = vsel %vm694_vm3, %v691_v36, %v693_v47  ;;  %v2335_v29 = vld [vmem:[%s3096_s1 + $0x68] sm:$0xff]  }
  0x9c   :  { %v911_v48 = vpop.permute.xlu0 %910  ;;  %v917_v49 = vpop.permute.xlu1 %916 }
  0x9d   :  { %v923_v52 = vsel %vm922_vm4, %v911_v48, %v913_v42  ;;  %v925_v63 = vsel %vm922_vm4, %v915_v45, %v917_v49  ;;  %v2337_v45 = vld [vmem:[%s3096_s1 + $0x78] sm:$0xff]  }
  0x9e   :  { %2211 = vmatmul.mubr.msk.bf16.gmra.mxu1 %vm92_vm1, %v2325_v30  ;;  %2213 = vmatmul.mubr.msk.bf16.gmra.mxu0 %vm92_vm1, %v2325_v30 }
  0x9f   :  { %418 = vmatprep.mubr.bf16.mxu1 %v2445_v5  ;;  %516 = vmatprep.mubr.bf16.mxu0 %v2445_v5 }
  0xa0   :  { %v919_v51 = vpop.permute.xlu0 %918  ;;  %v921_v55 = vpop.permute.xlu1 %920 }
  0xa1   :  { %v926_v54 = vsel %vm922_vm4, %v917_v49, %v919_v51  ;;  %v927_v60 = vsel %vm922_vm4, %v919_v51, %v921_v55  ;;  %v2339_v49 = vld [vmem:[%s3096_s1 + $0x88] sm:$0xff]  }
  0xa4   :  { %v1141_v57 = vpop.permute.xlu0 %1140  ;;  %v1143_v58 = vpop.permute.xlu1 %1142 }
  0xa5   :  { %v1152_v0 = vsel %vm1150_vm5, %v1141_v57, %v1143_v58 }
  0xa6   :  { %2214 = vmatmul.mubr.msk.bf16.vlgmr.msra.gmra.mxu1 %vm92_vm1, %v2324_v25  ;;  %2222 = vmatmul.mubr.msk.bf16.vlgmr.msra.gmra.mxu0 %vm92_vm1, %v2326_v33 }
  0xa7   :  { %552 = vmatpush1.bf16.msra.mxu1 %v469_v37  ;;  %605 = vmatpush1.bf16.msra.mxu0 %v471_v34 }
  0xa8   :  { %428 = vmatprep.mubr.bf16.mxu1 %v2445_v5  ;;  %526 = vmatprep.mubr.bf16.mxu0 %v2445_v5  ;;  %v1145_v61 = vpop.permute.xlu0 %1144  ;;  %v1147_v62 = vpop.permute.xlu1 %1146 }
  0xa9   :  { %726 = vmatprep.subr.bf16.mxu1 %v696_v38  ;;  %779 = vmatprep.subr.bf16.mxu0 %v698_v39  ;;  %v1154_v1 = vsel %vm1150_vm5, %v1145_v61, %v1147_v62  ;;  %v1153_v6 = vsel %vm1150_vm5, %v1143_v58, %v1145_v61  ;;  %v2336_v39 = vld [vmem:[%s3096_s1 + $0x70] sm:$0xff]  }
  0xac   :  { %v1139_v3 = vpop.permute.xlu0 %1138  ;;  %v1369_v4 = vpop.permute.xlu1 %1368 }
  0xad   :  { %v1151_v7 = vsel %vm1150_vm5, %v1139_v3, %v1141_v57 }
  0xae   :  { %2215 = vmatmul.mubr.msk.bf16.gmra.mxu1 %vm92_vm1, %v2325_v30  ;;  %2223 = vmatmul.mubr.msk.bf16.gmra.mxu0 %vm92_vm1, %v2327_v40 }
  0xaf   :  { %569 = vmatprep.mubr.bf16.mxu1 %v2445_v5  ;;  %622 = vmatprep.mubr.bf16.mxu0 %v2445_v5 }
  0xb0   :  { %v1371_v8 = vpop.permute.xlu0 %1370  ;;  %v1149_v10 = vpop.permute.xlu1 %1148 }
  0xb1   :  { %v1380_v9 = vsel %vm1378_vm6, %v1369_v4, %v1371_v8  ;;  %v1155_v16 = vsel %vm1150_vm5, %v1147_v62, %v1149_v10 }
  0xb4   :  { %v1367_v11 = vpop.permute.xlu0 %1366  ;;  %v1373_v12 = vpop.permute.xlu1 %1372 }
  0xb5   :  { %v1379_v15 = vsel %vm1378_vm6, %v1367_v11, %v1369_v4  ;;  %v1381_v26 = vsel %vm1378_vm6, %v1371_v8, %v1373_v12 }
  0xb6   :  { %2224 = vmatmul.mubr.msk.bf16.vlgmr.msra.gmra.mxu1 %vm92_vm1, %v2326_v33  ;;  %2226 = vmatmul.mubr.msk.bf16.vlgmr.msra.gmra.mxu0 %vm92_vm1, %v2326_v33 }
  0xb7   :  { %727 = vmatpush1.bf16.msra.mxu1 %v695_v44  ;;  %780 = vmatpush1.bf16.msra.mxu0 %v697_v43 }
  0xb8   :  { %579 = vmatprep.mubr.bf16.mxu1 %v2445_v5  ;;  %632 = vmatprep.mubr.bf16.mxu0 %v2445_v5  ;;  %v1375_v14 = vpop.permute.xlu0 %1374  ;;  %v1377_v18 = vpop.permute.xlu1 %1376 }
  0xb9   :  { %954 = vmatprep.subr.bf16.mxu0 %v924_v46  ;;  %832 = vmatprep.subr.bf16.mxu1 %v693_v47  ;;  %v1382_v17 = vsel %vm1378_vm6, %v1373_v12, %v1375_v14  ;;  %v1383_v23 = vsel %vm1378_vm6, %v1375_v14, %v1377_v18  ;;  %v2338_v46 = vld [vmem:[%s3096_s1 + $0x80] sm:$0xff]  }
  0xbc   :  { %v1597_v20 = vpop.permute.xlu0 %1596  ;;  %v1599_v21 = vpop.permute.xlu1 %1598 }
  0xbd   :  { %v1608_v27 = vsel %vm1606_vm7, %v1597_v20, %v1599_v21 }
  0xbe   :  { %2225 = vmatmul.mubr.msk.bf16.gmra.mxu1 %vm92_vm1, %v2327_v40  ;;  %2227 = vmatmul.mubr.msk.bf16.gmra.mxu0 %vm92_vm1, %v2327_v40 }
  0xbf   :  { %744 = vmatprep.mubr.bf16.mxu1 %v2445_v5  ;;  %797 = vmatprep.mubr.bf16.mxu0 %v2445_v5 }
  0xc0   :  { %v1601_v24 = vpop.permute.xlu0 %1600  ;;  %v1603_v25 = vpop.permute.xlu1 %1602 }
  0xc1   :  { %v1610_v28 = vsel %vm1606_vm7, %v1601_v24, %v1603_v25  ;;  %v1609_v32 = vsel %vm1606_vm7, %v1599_v21, %v1601_v24 }
  0xc4   :  { %v1595_v30 = vpop.permute.xlu0 %1594  ;;  %v1825_v31 = vpop.permute.xlu1 %1824 }
  0xc5   :  { %v1607_v33 = vsel %vm1606_vm7, %v1595_v30, %v1597_v20 }
  0xc6   :  { %2234 = vmatmul.mubr.msk.bf16.vlgmr.msra.gmra.mxu1 %vm92_vm1, %v2328_v50  ;;  %2236 = vmatmul.mubr.msk.bf16.vlgmr.msra.gmra.mxu0 %vm92_vm1, %v2328_v50 }
  0xc7   :  { %833 = vmatpush1.bf16.msra.mxu1 %v699_v53  ;;  %955 = vmatpush1.bf16.msra.mxu0 %v923_v52 }
  0xc8   :  { %754 = vmatprep.mubr.bf16.mxu1 %v2445_v5  ;;  %807 = vmatprep.mubr.bf16.mxu0 %v2445_v5  ;;  %v1827_v34 = vpop.permute.xlu0 %1826  ;;  %v1605_v36 = vpop.permute.xlu1 %1604 }
  0xc9   :  { %1007 = vmatprep.subr.bf16.mxu1 %v926_v54  ;;  %1060 = vmatprep.subr.bf16.mxu0 %v921_v55  ;;  %v1836_v35 = vsel %vm1834_vm8, %v1825_v31, %v1827_v34  ;;  %v1611_v42 = vsel %vm1606_vm7, %v1603_v25, %v1605_v36 }
  0xcc   :  { %v1823_v37 = vpop.permute.xlu0 %1822  ;;  %v1829_v38 = vpop.permute.xlu1 %1828 }
  0xcd   :  { %v1835_v41 = vsel %vm1834_vm8, %v1823_v37, %v1825_v31  ;;  %v1837_v48 = vsel %vm1834_vm8, %v1827_v34, %v1829_v38 }
  0xce   :  { %2235 = vmatmul.mubr.msk.bf16.gmra.mxu1 %vm92_vm1, %v2329_v56  ;;  %2237 = vmatmul.mubr.msk.bf16.gmra.mxu0 %vm92_vm1, %v2329_v56 }
  0xcf   :  { %850 = vmatprep.mubr.bf16.mxu1 %v2445_v5  ;;  %972 = vmatprep.mubr.bf16.mxu0 %v2445_v5 }
  0xd0   :  { %v1831_v40 = vpop.permute.xlu0 %1830  ;;  %v1833_v44 = vpop.permute.xlu1 %1832 }
  0xd1   :  { %v1838_v43 = vsel %vm1834_vm8, %v1829_v38, %v1831_v40  ;;  %v1839_v47 = vsel %vm1834_vm8, %v1831_v40, %v1833_v44 }
  0xd6   :  { %2238 = vmatmul.mubr.msk.bf16.vlgmr.msra.gmra.mxu1 %vm92_vm1, %v2328_v50  ;;  %2246 = vmatmul.mubr.msk.bf16.vlgmr.msra.gmra.mxu0 %vm92_vm1, %v2330_v59 }
  0xd7   :  { %1008 = vmatpush1.bf16.msra.mxu1 %v925_v63  ;;  %1061 = vmatpush1.bf16.msra.mxu0 %v927_v60 }
  0xd8   :  { %860 = vmatprep.mubr.bf16.mxu1 %v2445_v5  ;;  %982 = vmatprep.mubr.bf16.mxu0 %v2445_v5 }
  0xd9   :  { %1182 = vmatprep.subr.bf16.mxu1 %v1152_v0  ;;  %1235 = vmatprep.subr.bf16.mxu0 %v1154_v1 }
  0xde   :  { %2239 = vmatmul.mubr.msk.bf16.gmra.mxu1 %vm92_vm1, %v2329_v56  ;;  %2247 = vmatmul.mubr.msk.bf16.gmra.mxu0 %vm92_vm1, %v2331_v2 }
  0xdf   :  { %1025 = vmatprep.mubr.bf16.mxu1 %v2445_v5  ;;  %1078 = vmatprep.mubr.bf16.mxu0 %v2445_v5 }
  0xe6   :  { %2248 = vmatmul.mubr.msk.bf16.vlgmr.msra.gmra.mxu1 %vm92_vm1, %v2330_v59  ;;  %2250 = vmatmul.mubr.msk.bf16.vlgmr.msra.gmra.mxu0 %vm92_vm1, %v2330_v59 }
  0xe7   :  { %1183 = vmatpush1.bf16.msra.mxu1 %v1151_v7  ;;  %1236 = vmatpush1.bf16.msra.mxu0 %v1153_v6 }
  0xe8   :  { %1035 = vmatprep.mubr.bf16.mxu1 %v2445_v5  ;;  %1088 = vmatprep.mubr.bf16.mxu0 %v2445_v5 }
  0xe9   :  { %1410 = vmatprep.subr.bf16.mxu0 %v1380_v9  ;;  %1288 = vmatprep.subr.bf16.mxu1 %v1149_v10 }
  0xee   :  { %2249 = vmatmul.mubr.msk.bf16.gmra.mxu1 %vm92_vm1, %v2331_v2  ;;  %2251 = vmatmul.mubr.msk.bf16.gmra.mxu0 %vm92_vm1, %v2331_v2 }
  0xef   :  { %1200 = vmatprep.mubr.bf16.mxu1 %v2445_v5  ;;  %1253 = vmatprep.mubr.bf16.mxu0 %v2445_v5 }
  0xf6   :  { %2258 = vmatmul.mubr.msk.bf16.vlgmr.msra.gmra.mxu1 %vm92_vm1, %v2332_v13  ;;  %2260 = vmatmul.mubr.msk.bf16.vlgmr.msra.gmra.mxu0 %vm92_vm1, %v2332_v13 }
  0xf7   :  { %1289 = vmatpush1.bf16.msra.mxu1 %v1155_v16  ;;  %1411 = vmatpush1.bf16.msra.mxu0 %v1379_v15 }
  0xf8   :  { %1210 = vmatprep.mubr.bf16.mxu1 %v2445_v5  ;;  %1263 = vmatprep.mubr.bf16.mxu0 %v2445_v5 }
  0xf9   :  { %1463 = vmatprep.subr.bf16.mxu1 %v1382_v17  ;;  %1516 = vmatprep.subr.bf16.mxu0 %v1377_v18 }
  0xfe   :  { %2259 = vmatmul.mubr.msk.bf16.gmra.mxu1 %vm92_vm1, %v2333_v19  ;;  %2261 = vmatmul.mubr.msk.bf16.gmra.mxu0 %vm92_vm1, %v2333_v19 }
  0xff   :  { %1306 = vmatprep.mubr.bf16.mxu1 %v2445_v5  ;;  %1428 = vmatprep.mubr.bf16.mxu0 %v2445_v5 }
 0x106   :  { %2262 = vmatmul.mubr.msk.bf16.vlgmr.msra.gmra.mxu1 %vm92_vm1, %v2332_v13  ;;  %2270 = vmatmul.mubr.msk.bf16.vlgmr.msra.gmra.mxu0 %vm92_vm1, %v2334_v22 }
 0x107   :  { %1464 = vmatpush1.bf16.msra.mxu1 %v1381_v26  ;;  %1517 = vmatpush1.bf16.msra.mxu0 %v1383_v23 }
 0x108   :  { %1316 = vmatprep.mubr.bf16.mxu1 %v2445_v5  ;;  %1438 = vmatprep.mubr.bf16.mxu0 %v2445_v5 }
 0x109   :  { %1638 = vmatprep.subr.bf16.mxu1 %v1608_v27  ;;  %1691 = vmatprep.subr.bf16.mxu0 %v1610_v28 }
 0x10e   :  { %2263 = vmatmul.mubr.msk.bf16.gmra.mxu1 %vm92_vm1, %v2333_v19  ;;  %2271 = vmatmul.mubr.msk.bf16.gmra.mxu0 %vm92_vm1, %v2335_v29 }
 0x10f   :  { %1481 = vmatprep.mubr.bf16.mxu1 %v2445_v5  ;;  %1534 = vmatprep.mubr.bf16.mxu0 %v2445_v5 }
 0x116   :  { %2272 = vmatmul.mubr.msk.bf16.vlgmr.msra.gmra.mxu1 %vm92_vm1, %v2334_v22  ;;  %2274 = vmatmul.mubr.msk.bf16.vlgmr.msra.gmra.mxu0 %vm92_vm1, %v2334_v22 }
 0x117   :  { %1639 = vmatpush1.bf16.msra.mxu1 %v1607_v33  ;;  %1692 = vmatpush1.bf16.msra.mxu0 %v1609_v32 }
 0x118   :  { %1491 = vmatprep.mubr.bf16.mxu1 %v2445_v5  ;;  %1544 = vmatprep.mubr.bf16.mxu0 %v2445_v5 }
 0x119   :  { %1866 = vmatprep.subr.bf16.mxu0 %v1836_v35  ;;  %1744 = vmatprep.subr.bf16.mxu1 %v1605_v36 }
 0x11e   :  { %2273 = vmatmul.mubr.msk.bf16.gmra.mxu1 %vm92_vm1, %v2335_v29  ;;  %2275 = vmatmul.mubr.msk.bf16.gmra.mxu0 %vm92_vm1, %v2335_v29 }
 0x11f   :  { %1656 = vmatprep.mubr.bf16.mxu1 %v2445_v5  ;;  %1709 = vmatprep.mubr.bf16.mxu0 %v2445_v5 }
 0x126   :  { %2282 = vmatmul.mubr.msk.bf16.vlgmr.msra.gmra.mxu1 %vm92_vm1, %v2336_v39  ;;  %2284 = vmatmul.mubr.msk.bf16.vlgmr.msra.gmra.mxu0 %vm92_vm1, %v2336_v39 }
 0x127   :  { %1745 = vmatpush1.bf16.msra.mxu1 %v1611_v42  ;;  %1867 = vmatpush1.bf16.msra.mxu0 %v1835_v41 }
 0x128   :  { %1666 = vmatprep.mubr.bf16.mxu1 %v2445_v5  ;;  %1719 = vmatprep.mubr.bf16.mxu0 %v2445_v5 }
 0x129   :  { %1919 = vmatprep.subr.bf16.mxu1 %v1838_v43  ;;  %1972 = vmatprep.subr.bf16.mxu0 %v1833_v44 }
 0x12e   :  { %2283 = vmatmul.mubr.msk.bf16.gmra.mxu1 %vm92_vm1, %v2337_v45  ;;  %2285 = vmatmul.mubr.msk.bf16.gmra.mxu0 %vm92_vm1, %v2337_v45 }
 0x12f   :  { %1762 = vmatprep.mubr.bf16.mxu1 %v2445_v5  ;;  %1884 = vmatprep.mubr.bf16.mxu0 %v2445_v5 }
 0x136   :  { %2286 = vmatmul.mubr.msk.bf16.vlgmr.msra.gmra.mxu1 %vm92_vm1, %v2336_v39  ;;  %2294 = vmatmul.mubr.msk.bf16.vlgmr.msra.gmra.mxu0 %vm92_vm1, %v2338_v46 }
 0x137   :  { %1920 = vmatpush1.bf16.msra.mxu1 %v1837_v48  ;;  %1973 = vmatpush1.bf16.msra.mxu0 %v1839_v47 }
 0x138   :  { %1772 = vmatprep.mubr.bf16.mxu1 %v2445_v5  ;;  %1894 = vmatprep.mubr.bf16.mxu0 %v2445_v5 }
 0x13e   :  { %v133_v50 = vpop.f32.mrf.mxu0  ;;  %v143_v51 = vpop.f32.mrf.mxu1  ;;  %2287 = vmatmul.mubr.msk.bf16.gmra.mxu1 %vm92_vm1, %v2337_v45  ;;  %2295 = vmatmul.mubr.msk.bf16.gmra.mxu0 %vm92_vm1, %v2339_v49 }
 0x13f   :  { %1937 = vmatprep.mubr.bf16.mxu1 %v2445_v5  ;;  %1990 = vmatprep.mubr.bf16.mxu0 %v2445_v5 }
 0x140   :  { %v135_v52 = vpop.f32.mrf.mxu0  ;;  %v145_v53 = vpop.f32.mrf.mxu1 }
 0x142   :  { %v137_v54 = vpop.f32.mrf.mxu0  ;;  %v147_v55 = vpop.f32.mrf.mxu1 }
 0x144   :  { %v139_v56 = vpop.f32.mrf.mxu0  ;;  %v149_v57 = vpop.f32.mrf.mxu1 }
 0x146   :  { %v186_v58 = vpop.f32.mrf.mxu1  ;;  %v239_v59 = vpop.f32.mrf.mxu0  ;;  %2296 = vmatmul.mubr.msk.bf16.vlgmr.msra.gmra.mxu1 %vm92_vm1, %v2338_v46  ;;  %2298 = vmatmul.mubr.msk.bf16.vlgmr.msra.gmra.mxu0 %vm92_vm1, %v2338_v46 }
 0x147   :  { %1947 = vmatprep.mubr.bf16.mxu1 %v2445_v5  ;;  %2000 = vmatprep.mubr.bf16.mxu0 %v2445_v5 }
 0x148   :  { %v188_v60 = vpop.f32.mrf.mxu1  ;;  %v241_v61 = vpop.f32.mrf.mxu0 }
 0x14a   :  { %v190_v62 = vpop.f32.mrf.mxu1  ;;  %v243_v63 = vpop.f32.mrf.mxu0 }
 0x14c   :  { %v192_v0 = vpop.f32.mrf.mxu1  ;;  %v245_v1 = vpop.f32.mrf.mxu0 }
 0x14e   :  { %v196_v2 = vpop.f32.mrf.mxu1  ;;  %v249_v3 = vpop.f32.mrf.mxu0  ;;  %2297 = vmatmul.mubr.msk.bf16.gmra.mxu1 %vm92_vm1, %v2339_v49  ;;  %2299 = vmatmul.mubr.msk.bf16.gmra.mxu0 %vm92_vm1, %v2339_v49 }
 0x150   :  { %v198_v4 = vpop.f32.mrf.mxu1  ;;  %v251_v6 = vpop.f32.mrf.mxu0 }
 0x152   :  { %v200_v7 = vpop.f32.mrf.mxu1  ;;  %v253_v8 = vpop.f32.mrf.mxu0 }
 0x154   :  { %v202_v9 = vpop.f32.mrf.mxu1  ;;  %v2766_v10 = vpop.f32.mrf.mxu0 }
 0x156   :  { %v314_v5 = vpop.f32.mrf.mxu1  ;;  %v367_v11 = vpop.f32.mrf.mxu0 }
 0x157   :  { %v315_v12 = vadd.f32 %v314_v5, %v133_v50  ;;  %v2768_v13 = vadd.f32 %v367_v11, %v186_v58 }
 0x158   :  { %v316_v14 = vpop.f32.mrf.mxu1  ;;  %v369_v15 = vpop.f32.mrf.mxu0 }
 0x159   :  { %v317_v16 = vadd.f32 %v316_v14, %v135_v52  ;;  %v2770_v17 = vadd.f32 %v369_v15, %v188_v60 }
 0x15a   :  { %v318_v18 = vpop.f32.mrf.mxu1  ;;  %v371_v19 = vpop.f32.mrf.mxu0 }
 0x15b   :  { %v319_v20 = vadd.f32 %v318_v18, %v137_v54  ;;  %v2772_v21 = vadd.f32 %v371_v19, %v190_v62 }
 0x15c   :  { %v320_v22 = vpop.f32.mrf.mxu1  ;;  %v373_v23 = vpop.f32.mrf.mxu0 }
 0x15d   :  { %v321_v24 = vadd.f32 %v320_v22, %v139_v56  ;;  %v2774_v25 = vadd.f32 %v373_v23, %v192_v0 }
 0x15e   :  { %v324_v26 = vpop.f32.mrf.mxu1  ;;  %v377_v27 = vpop.f32.mrf.mxu0 }
 0x15f   :  { %v325_v28 = vadd.f32 %v324_v26, %v143_v51  ;;  %v2776_v29 = vadd.f32 %v377_v27, %v196_v2 }
 0x160   :  { %v326_v30 = vpop.f32.mrf.mxu1  ;;  %v379_v31 = vpop.f32.mrf.mxu0 }
 0x161   :  { %v327_v32 = vadd.f32 %v326_v30, %v145_v53  ;;  %v2778_v33 = vadd.f32 %v379_v31, %v198_v4 }
 0x162   :  { %v328_v34 = vpop.f32.mrf.mxu1  ;;  %v381_v35 = vpop.f32.mrf.mxu0 }
 0x163   :  { %v329_v36 = vadd.f32 %v328_v34, %v147_v55  ;;  %v2780_v37 = vadd.f32 %v381_v35, %v200_v7 }
 0x164   :  { %v330_v38 = vpop.f32.mrf.mxu1  ;;  %v383_v39 = vpop.f32.mrf.mxu0 }
 0x165   :  { %v331_v40 = vadd.f32 %v330_v38, %v149_v57  ;;  %v2782_v41 = vadd.f32 %v383_v39, %v202_v9 }
 0x166   :  { %v420_v42 = vpop.f32.mrf.mxu1  ;;  %v518_v43 = vpop.f32.mrf.mxu0 }
 0x167   :  { %v421_v44 = vadd.f32 %v420_v42, %v239_v59  ;;  %v2784_v45 = vadd.f32 %v518_v43, %v315_v12 }
 0x168   :  { %v422_v46 = vpop.f32.mrf.mxu1  ;;  %v520_v47 = vpop.f32.mrf.mxu0 }
 0x169   :  { %v423_v48 = vadd.f32 %v422_v46, %v241_v61  ;;  %v2786_v49 = vadd.f32 %v520_v47, %v317_v16 }
 0x16a   :  { %v424_v50 = vpop.f32.mrf.mxu1  ;;  %v522_v51 = vpop.f32.mrf.mxu0 }
 0x16b   :  { %v425_v52 = vadd.f32 %v424_v50, %v243_v63  ;;  %v2788_v53 = vadd.f32 %v522_v51, %v319_v20 }
 0x16c   :  { %v426_v54 = vpop.f32.mrf.mxu1  ;;  %v524_v55 = vpop.f32.mrf.mxu0 }
 0x16d   :  { %v427_v56 = vadd.f32 %v426_v54, %v245_v1  ;;  %v2790_v57 = vadd.f32 %v524_v55, %v321_v24 }
 0x16e   :  { %v430_v58 = vpop.f32.mrf.mxu1  ;;  %v528_v60 = vpop.f32.mrf.mxu0 }
 0x16f   :  { %v431_v59 = vadd.f32 %v430_v58, %v249_v3  ;;  %v2792_v62 = vadd.f32 %v528_v60, %v325_v28 }
 0x170   :  { %v432_v0 = vpop.f32.mrf.mxu1  ;;  %v530_v2 = vpop.f32.mrf.mxu0 }
 0x171   :  { %v433_v61 = vadd.f32 %v432_v0, %v251_v6  ;;  %v2794_v4 = vadd.f32 %v530_v2, %v327_v32 }
 0x172   :  { %v434_v7 = vpop.f32.mrf.mxu1  ;;  %v532_v9 = vpop.f32.mrf.mxu0 }
 0x173   :  { %v435_v63 = vadd.f32 %v434_v7, %v253_v8  ;;  %v2796_v5 = vadd.f32 %v532_v9, %v329_v36 }
 0x174   :  { %v436_v11 = vpop.f32.mrf.mxu1  ;;  %v534_v12 = vpop.f32.mrf.mxu0 }
 0x175   :  { %v437_v1 = vadd.f32 %v436_v11, %v2766_v10  ;;  %v2799_v14 = vadd.f32 %v534_v12, %v331_v40 }
 0x176   :  { %v571_v15 = vpop.f32.mrf.mxu1  ;;  %v624_v3 = vpop.f32.mrf.mxu0 }
 0x177   :  { %v645_v16 = vadd.f32 %v571_v15, %v2768_v13  ;;  %v2802_v18 = vadd.f32 %v624_v3, %v421_v44 }
 0x178   :  { %v573_v6 = vpop.f32.mrf.mxu1  ;;  %v626_v19 = vpop.f32.mrf.mxu0 }
 0x179   :  { %v646_v20 = vadd.f32 %v573_v6, %v2770_v17  ;;  %v2805_v22 = vadd.f32 %v626_v19, %v423_v48 }
 0x17a   :  { %v575_v8 = vpop.f32.mrf.mxu1  ;;  %v628_v23 = vpop.f32.mrf.mxu0 }
 0x17b   :  { %v651_v24 = vadd.f32 %v575_v8, %v2772_v21  ;;  %v2808_v26 = vadd.f32 %v628_v23, %v425_v52 }
 0x17c   :  { %v577_v10 = vpop.f32.mrf.mxu1  ;;  %v630_v27 = vpop.f32.mrf.mxu0 }
 0x17d   :  { %v652_v28 = vadd.f32 %v577_v10, %v2774_v25  ;;  %v2811_v30 = vadd.f32 %v630_v27, %v427_v56 }
 0x17e   :  { %v581_v13 = vpop.f32.mrf.mxu1  ;;  %v634_v31 = vpop.f32.mrf.mxu0 }
 0x17f   :  { %v657_v32 = vadd.f32 %v581_v13, %v2776_v29  ;;  %v2814_v34 = vadd.f32 %v634_v31, %v431_v59 }
 0x180   :  { %v583_v17 = vpop.f32.mrf.mxu1  ;;  %v636_v35 = vpop.f32.mrf.mxu0 }
 0x181   :  { %v658_v36 = vadd.f32 %v583_v17, %v2778_v33  ;;  %v2817_v38 = vadd.f32 %v636_v35, %v433_v61 }
 0x182   :  { %v585_v21 = vpop.f32.mrf.mxu1  ;;  %v638_v39 = vpop.f32.mrf.mxu0 }
 0x183   :  { %v663_v40 = vadd.f32 %v585_v21, %v2780_v37  ;;  %v2820_v42 = vadd.f32 %v638_v39, %v435_v63 }
 0x184   :  { %v587_v25 = vpop.f32.mrf.mxu1  ;;  %v640_v43 = vpop.f32.mrf.mxu0 }
 0x185   :  { %v664_v44 = vadd.f32 %v587_v25, %v2782_v41  ;;  %v2823_v46 = vadd.f32 %v640_v43, %v437_v1 }
 0x186   :  { %v746_v29 = vpop.f32.mrf.mxu1  ;;  %v799_v47 = vpop.f32.mrf.mxu0 }
 0x187   :  { %v871_v48 = vadd.f32 %v746_v29, %v2784_v45  ;;  %v2826_v50 = vadd.f32 %v799_v47, %v645_v16 }
 0x188   :  { %v748_v33 = vpop.f32.mrf.mxu1  ;;  %v801_v51 = vpop.f32.mrf.mxu0 }
 0x189   :  { %v872_v52 = vadd.f32 %v748_v33, %v2786_v49  ;;  %v2829_v54 = vadd.f32 %v801_v51, %v646_v20 }
 0x18a   :  { %v750_v37 = vpop.f32.mrf.mxu1  ;;  %v803_v55 = vpop.f32.mrf.mxu0 }
 0x18b   :  { %v877_v56 = vadd.f32 %v750_v37, %v2788_v53  ;;  %v2832_v58 = vadd.f32 %v803_v55, %v651_v24 }
 0x18c   :  { %v752_v41 = vpop.f32.mrf.mxu1  ;;  %v805_v60 = vpop.f32.mrf.mxu0 }
 0x18d   :  { %v878_v59 = vadd.f32 %v752_v41, %v2790_v57  ;;  %v2835_v0 = vadd.f32 %v805_v60, %v652_v28 }
 0x18e   :  { %v756_v45 = vpop.f32.mrf.mxu1  ;;  %v809_v2 = vpop.f32.mrf.mxu0 }
 0x18f   :  { %v883_v61 = vadd.f32 %v756_v45, %v2792_v62  ;;  %v2838_v7 = vadd.f32 %v809_v2, %v657_v32 }
 0x190   :  { %v758_v49 = vpop.f32.mrf.mxu1  ;;  %v811_v9 = vpop.f32.mrf.mxu0 }
 0x191   :  { %v884_v63 = vadd.f32 %v758_v49, %v2794_v4  ;;  %v2841_v11 = vadd.f32 %v811_v9, %v658_v36 }
 0x192   :  { %v760_v53 = vpop.f32.mrf.mxu1  ;;  %v813_v12 = vpop.f32.mrf.mxu0 }
 0x193   :  { %v889_v1 = vadd.f32 %v760_v53, %v2796_v5  ;;  %v2844_v15 = vadd.f32 %v813_v12, %v663_v40 }
 0x194   :  { %v762_v57 = vpop.f32.mrf.mxu1  ;;  %v815_v3 = vpop.f32.mrf.mxu0 }
 0x195   :  { %v890_v16 = vadd.f32 %v762_v57, %v2799_v14  ;;  %v2847_v6 = vadd.f32 %v815_v3, %v664_v44 }
 0x196   :  { %v852_v62 = vpop.f32.mrf.mxu1  ;;  %v974_v19 = vpop.f32.mrf.mxu0 }
 0x197   :  { %v875_v20 = vadd.f32 %v852_v62, %v2802_v18  ;;  %v2850_v8 = vadd.f32 %v974_v19, %v871_v48 }
 0x198   :  { %v854_v4 = vpop.f32.mrf.mxu1  ;;  %v976_v23 = vpop.f32.mrf.mxu0 }
 0x199   :  { %v876_v24 = vadd.f32 %v854_v4, %v2805_v22  ;;  %v2853_v10 = vadd.f32 %v976_v23, %v872_v52 }
 0x19a   :  { %v856_v5 = vpop.f32.mrf.mxu1  ;;  %v978_v27 = vpop.f32.mrf.mxu0 }
 0x19b   :  { %v881_v28 = vadd.f32 %v856_v5, %v2808_v26  ;;  %v2856_v13 = vadd.f32 %v978_v27, %v877_v56 }
 0x19c   :  { %v858_v14 = vpop.f32.mrf.mxu1  ;;  %v980_v31 = vpop.f32.mrf.mxu0 }
 0x19d   :  { %v882_v32 = vadd.f32 %v858_v14, %v2811_v30  ;;  %v2859_v17 = vadd.f32 %v980_v31, %v878_v59 }
 0x19e   :  { %v862_v18 = vpop.f32.mrf.mxu1  ;;  %v984_v35 = vpop.f32.mrf.mxu0 }
 0x19f   :  { %v887_v36 = vadd.f32 %v862_v18, %v2814_v34  ;;  %v1111_v21 = vadd.f32 %v984_v35, %v883_v61 }
 0x1a0   :  { %v864_v22 = vpop.f32.mrf.mxu1  ;;  %v986_v39 = vpop.f32.mrf.mxu0 }
 0x1a1   :  { %v888_v40 = vadd.f32 %v864_v22, %v2817_v38  ;;  %v1112_v25 = vadd.f32 %v986_v39, %v884_v63 }
 0x1a2   :  { %v866_v43 = vpop.f32.mrf.mxu1  ;;  %v988_v26 = vpop.f32.mrf.mxu0 }
 0x1a3   :  { %v893_v44 = vadd.f32 %v866_v43, %v2820_v42  ;;  %v2864_v29 = vadd.f32 %v988_v26, %v889_v1 }
 0x1a4   :  { %v868_v47 = vpop.f32.mrf.mxu1  ;;  %v990_v30 = vpop.f32.mrf.mxu0 }
 0x1a5   :  { %v894_v48 = vadd.f32 %v868_v47, %v2823_v46  ;;  %v2867_v33 = vadd.f32 %v990_v30, %v890_v16 }
 0x1a6   :  { %v1027_v51 = vpop.f32.mrf.mxu1  ;;  %v1080_v34 = vpop.f32.mrf.mxu0 }
 0x1a7   :  { %v1101_v52 = vadd.f32 %v1027_v51, %v2826_v50  ;;  %v1103_v37 = vadd.f32 %v1080_v34, %v875_v20 }
 0x1a8   :  { %v1029_v55 = vpop.f32.mrf.mxu1  ;;  %v1082_v38 = vpop.f32.mrf.mxu0 }
 0x1a9   :  { %v1102_v56 = vadd.f32 %v1029_v55, %v2829_v54  ;;  %v1104_v41 = vadd.f32 %v1082_v38, %v876_v24 }
 0x1aa   :  { %v1031_v60 = vpop.f32.mrf.mxu1  ;;  %v1084_v42 = vpop.f32.mrf.mxu0 }
 0x1ab   :  { %v1107_v59 = vadd.f32 %v1031_v60, %v2832_v58  ;;  %v1109_v45 = vadd.f32 %v1084_v42, %v881_v28 }
 0x1ac   :  { %v1033_v2 = vpop.f32.mrf.mxu1  ;;  %v1086_v61 = vpop.f32.mrf.mxu0 }
 0x1ad   :  { %v1108_v46 = vadd.f32 %v1033_v2, %v2835_v0  ;;  %v1110_v49 = vadd.f32 %v1086_v61, %v882_v32 }
 0x1ae   :  { %v1037_v9 = vpop.f32.mrf.mxu1  ;;  %v1090_v63 = vpop.f32.mrf.mxu0 }
 0x1af   :  { %v1113_v50 = vadd.f32 %v1037_v9, %v2838_v7  ;;  %v1115_v53 = vadd.f32 %v1090_v63, %v887_v36 }
 0x1b0   :  { %v1039_v12 = vpop.f32.mrf.mxu1  ;;  %v1092_v1 = vpop.f32.mrf.mxu0 }
 0x1b1   :  { %v1114_v54 = vadd.f32 %v1039_v12, %v2841_v11  ;;  %v1116_v57 = vadd.f32 %v1092_v1, %v888_v40 }
 0x1b2   :  { %v1041_v3 = vpop.f32.mrf.mxu1  ;;  %v1094_v16 = vpop.f32.mrf.mxu0 }
 0x1b3   :  { %v1119_v58 = vadd.f32 %v1041_v3, %v2844_v15  ;;  %v2876_v62 = vadd.f32 %v1094_v16, %v893_v44 }
 0x1b4   :  { %v1043_v19 = vpop.f32.mrf.mxu1  ;;  %v1096_v20 = vpop.f32.mrf.mxu0 }
 0x1b5   :  { %v1120_v0 = vadd.f32 %v1043_v19, %v2847_v6  ;;  %v2879_v4 = vadd.f32 %v1096_v20, %v894_v48 }
 0x1b6   :  { %v2881_v23 = vpop.f32.mrf.mxu1  ;;  %v1255_v7 = vpop.f32.mrf.mxu0 }
 0x1b7   :  { %v2883_v24 = vadd.f32 %v1255_v7, %v1101_v52 }
 0x1b8   :  { %v2885_v5 = vpop.f32.mrf.mxu1  ;;  %v1257_v11 = vpop.f32.mrf.mxu0 }
 0x1b9   :  { %v2887_v27 = vadd.f32 %v1257_v11, %v1102_v56 }
 0x1ba   :  { %v2889_v28 = vpop.f32.mrf.mxu1  ;;  %v1259_v15 = vpop.f32.mrf.mxu0 }
 0x1bb   :  { %v2891_v14 = vadd.f32 %v1259_v15, %v1107_v59 }
 0x1bc   :  { %v2893_v31 = vpop.f32.mrf.mxu1  ;;  %v1261_v6 = vpop.f32.mrf.mxu0 }
 0x1bd   :  { %v2895_v32 = vadd.f32 %v1261_v6, %v1108_v46 }
 0x1be   :  { %v1212_v18 = vpop.f32.mrf.mxu1  ;;  %v1265_v35 = vpop.f32.mrf.mxu0 }
 0x1bf   :  { %v2897_v36 = vadd.f32 %v1212_v18, %v1111_v21  ;;  %v2899_v22 = vadd.f32 %v1265_v35, %v1113_v50 }
 0x1c0   :  { %v1214_v39 = vpop.f32.mrf.mxu1  ;;  %v1267_v40 = vpop.f32.mrf.mxu0 }
 0x1c1   :  { %3100 = vst [vmem:[#allocation8_spill] sm:$0xff] %v2899_v22  ;;  %v2901_v43 = vadd.f32 %v1214_v39, %v1112_v25  ;;  %v2903_v26 = vadd.f32 %v1267_v40, %v1114_v54 }
 0x1c2   :  { %v2905_v44 = vpop.f32.mrf.mxu1  ;;  %v1269_v47 = vpop.f32.mrf.mxu0 }
 0x1c3   :  { %3101 = vst [vmem:[#allocation9_spill] sm:$0xff] %v2903_v26  ;;  %v2907_v30 = vadd.f32 %v1269_v47, %v1119_v58 }
 0x1c4   :  { %v2909_v48 = vpop.f32.mrf.mxu1  ;;  %v1271_v51 = vpop.f32.mrf.mxu0 }
 0x1c5   :  { %3102 = vst [vmem:[#allocation10_spill] sm:$0xff] %v2907_v30  ;;  %v2911_v34 = vadd.f32 %v1271_v51, %v1120_v0  ;;  %v1333_v30 = vadd.f32 %v2889_v28, %v2856_v13 }
 0x1c6   :  { %v1308_v21 = vpop.f32.mrf.mxu1  ;;  %v1430_v52 = vpop.f32.mrf.mxu0 }
 0x1c7   :  { %3103 = vst [vmem:[#allocation11_spill] sm:$0xff] %v2911_v34  ;;  %v2913_v55 = vadd.f32 %v1308_v21, %v1103_v37 }
 0x1c8   :  { %v1310_v38 = vpop.f32.mrf.mxu1  ;;  %v1432_v56 = vpop.f32.mrf.mxu0 }
 0x1c9   :  { %v2915_v25 = vadd.f32 %v1310_v38, %v1104_v41 }
 0x1ca   :  { %v1312_v60 = vpop.f32.mrf.mxu1  ;;  %v1434_v42 = vpop.f32.mrf.mxu0 }
 0x1cb   :  { %v2917_v59 = vadd.f32 %v1312_v60, %v1109_v45 }
 0x1cc   :  { %v1314_v2 = vpop.f32.mrf.mxu1  ;;  %v1436_v61 = vpop.f32.mrf.mxu0 }
 0x1cd   :  { %v2919_v46 = vadd.f32 %v1314_v2, %v1110_v49 }
 0x1ce   :  { %v1318_v9 = vpop.f32.mrf.mxu1  ;;  %v2921_v63 = vpop.f32.mrf.mxu0 }
 0x1cf   :  { %v1343_v50 = vadd.f32 %v1318_v9, %v1115_v53 }
 0x1d0   :  { %v1320_v12 = vpop.f32.mrf.mxu1  ;;  %v2923_v1 = vpop.f32.mrf.mxu0 }
 0x1d1   :  { %v1344_v37 = vadd.f32 %v1320_v12, %v1116_v57 }
 0x1d2   :  { %v2925_v54 = vpop.f32.mrf.mxu1  ;;  %v2927_v41 = vpop.f32.mrf.mxu0 }
 0x1d4   :  { %v2929_v3 = vpop.f32.mrf.mxu1  ;;  %v2931_v45 = vpop.f32.mrf.mxu0 }
 0x1d6   :  { %v2933_v16 = vpop.f32.mrf.mxu1  ;;  %v2935_v49 = vpop.f32.mrf.mxu0 }
 0x1d8   :  { %v2937_v58 = vpop.f32.mrf.mxu1  ;;  %v2939_v19 = vpop.f32.mrf.mxu0 }
 0x1da   :  { %v2941_v53 = vpop.f32.mrf.mxu1  ;;  %v2943_v20 = vpop.f32.mrf.mxu0 }
 0x1dc   :  { %v2945_v57 = vpop.f32.mrf.mxu1  ;;  %v2947_v0 = vpop.f32.mrf.mxu0 }
 0x1de   :  { %v2949_v7 = vpop.f32.mrf.mxu1  ;;  %v1546_v11 = vpop.f32.mrf.mxu0 }
 0x1df   :  { %3104 = vst [vmem:[#allocation12_spill] sm:$0xff] %v2949_v7  ;;  %v2951_v15 = vadd.f32 %v1546_v11, %v1343_v50 }
 0x1e0   :  { %v2953_v6 = vpop.f32.mrf.mxu1  ;;  %v1548_v18 = vpop.f32.mrf.mxu0 }
 0x1e1   :  { %3105 = vst [vmem:[#allocation13_spill] sm:$0xff] %v2951_v15  ;;  %3106 = vst [vmem:[#allocation14_spill] sm:$0xff] %v2953_v6  ;;  %v2955_v35 = vadd.f32 %v1548_v18, %v1344_v37  ;;  %v1327_v6 = vadd.f32 %v2881_v23, %v2850_v8  ;;  %v1334_v8 = vadd.f32 %v2893_v31, %v2859_v17 }
 0x1e2   :  { %v2957_v39 = vpop.f32.mrf.mxu1  ;;  %v2959_v40 = vpop.f32.mrf.mxu0  ;;  %v1561_v23 = vadd.f32 %v1434_v42, %v1333_v30  ;;  %v1345_v17 = vadd.f32 %v2905_v44, %v2864_v29  ;;  %v1346_v42 = vadd.f32 %v2909_v48, %v2867_v33  ;;  %v1568_v29 = vadd.f32 %v2923_v1, %v2901_v43 }
 0x1e3   :  { %3107 = vst [vmem:[#allocation15_spill] sm:$0xff] %v2955_v35  ;;  %3108 = vst [vmem:[#allocation16_spill] sm:$0xff] %v2957_v39  ;;  %v1555_v34 = vadd.f32 %v1430_v52, %v1327_v6 }
 0x1e4   :  { %3109 = vst [vmem:[#allocation17_spill] sm:$0xff] %v2959_v40  ;;  %v2961_v47 = vpop.f32.mrf.mxu1  ;;  %v2963_v51 = vpop.f32.mrf.mxu0 }
 0x1e5   :  { %3110 = vst [vmem:[#allocation18_spill] sm:$0xff] %v2961_v47  ;;  %3111 = vst [vmem:[#allocation19_spill] sm:$0xff] %v2963_v51  ;;  %v1328_v47 = vadd.f32 %v2885_v5, %v2853_v10  ;;  %v1562_v5 = vadd.f32 %v1436_v61, %v1334_v8 }
 0x1e6   :  { %v1658_v21 = vpop.f32.mrf.mxu1  ;;  %v2965_v38 = vpop.f32.mrf.mxu0 }
 0x1e8   :  { %v1660_v60 = vpop.f32.mrf.mxu1  ;;  %v2967_v2 = vpop.f32.mrf.mxu0 }
 0x1e9   :  { %3112 = vst [vmem:[#allocation20_spill] sm:$0xff] %v2967_v2 }
 0x1ea   :  { %v1662_v9 = vpop.f32.mrf.mxu1  ;;  %v2969_v50 = vpop.f32.mrf.mxu0 }
 0x1eb   :  { %3113 = vst [vmem:[#allocation21_spill] sm:$0xff] %v2969_v50  ;;  %v1789_v52 = vadd.f32 %v1662_v9, %v1561_v23  ;;  %v1574_v9 = vadd.f32 %v2931_v45, %v1346_v42 }
 0x1ec   :  { %v1664_v12 = vpop.f32.mrf.mxu1  ;;  %v2971_v37 = vpop.f32.mrf.mxu0 }
 0x1ed   :  { %3114 = vst [vmem:[#allocation22_spill] sm:$0xff] %v2971_v37  ;;  %v1783_v37 = vadd.f32 %v1658_v21, %v1555_v34  ;;  %v1790_v28 = vadd.f32 %v1664_v12, %v1562_v5  ;;  %v1557_v12 = vadd.f32 %v2933_v16, %v2883_v24  ;;  %v3020_v24 = vadd.f32 %v2925_v54, %v2876_v62 }
 0x1ee   :  { %v1668_v11 = vpop.f32.mrf.mxu1  ;;  %v2973_v18 = vpop.f32.mrf.mxu0  ;;  %v3024_v16 = vadd.f32 %v2929_v3, %v2879_v4  ;;  %v1565_v62 = vadd.f32 %v2943_v20, %v2917_v59  ;;  %v1564_v4 = vadd.f32 %v2945_v57, %v2895_v32 }
 0x1ef   :  { %3115 = vst [vmem:[#allocation23_spill] sm:$0xff] %v2973_v18  ;;  %v1556_v18 = vadd.f32 %v1432_v56, %v1328_v47 }
 0x1f0   :  { %v1670_v35 = vpop.f32.mrf.mxu1  ;;  %v2975_v15 = vpop.f32.mrf.mxu0 }
 0x1f1   :  { %3116 = vst [vmem:[#allocation24_spill] sm:$0xff] %v2975_v15  ;;  %v1784_v2 = vadd.f32 %v1660_v60, %v1556_v18 }
 0x1f2   :  { %v1672_v26 = vpop.f32.mrf.mxu1  ;;  %v2979_v51 = vpop.f32.mrf.mxu0  ;;  %v3122_v59 = vld [vmem:[#allocation21_spill] sm:$0xff] }
 0x1f3   :  { %3117 = vst [vmem:[#allocation25_spill] sm:$0xff] %v2979_v51 }
 0x1f4   :  { %v1674_v40 = vpop.f32.mrf.mxu1  ;;  %v2983_v39 = vpop.f32.mrf.mxu0 }
 0x1f5   :  { %3118 = vst [vmem:[#allocation26_spill] sm:$0xff] %v2983_v39  ;;  %v1802_v18 = vadd.f32 %v1674_v40, %v1574_v9 }
 0x1f6   :  { %v1764_v50 = vpop.f32.mrf.mxu1  ;;  %v1886_v15 = vpop.f32.mrf.mxu0 }
 0x1f7   :  { %v2011_v51 = vadd.f32 %v1886_v15, %v1783_v37  ;;  %v1796_v37 = vadd.f32 %v1670_v35, %v1568_v29 }
 0x1f8   :  { %v2989_v7 = vpop.f32.mrf.mxu1  ;;  %v1888_v10 = vpop.f32.mrf.mxu0 }
 0x1f9   :  { %v2035_v6 = vmul.f32 0.5, %v2011_v51  ;;  %v2012_v39 = vadd.f32 %v1888_v10, %v1784_v2  ;;  %v1573_v51 = vadd.f32 %v2927_v41, %v1345_v17  ;;  %v1559_v41 = vadd.f32 %v2935_v49, %v2913_v55 }
 0x1fa   :  { %v2991_v22 = vpop.f32.mrf.mxu1  ;;  %v1890_v13 = vpop.f32.mrf.mxu0  ;;  %v1558_v55 = vadd.f32 %v2937_v58, %v2887_v27  ;;  %v1560_v27 = vadd.f32 %v2939_v19, %v2915_v25  ;;  %v1566_v58 = vadd.f32 %v2947_v0, %v2919_v46 }
 0x1fb   :  { %v2036_v34 = vmul.f32 0.5, %v2012_v39  ;;  %v2017_v56 = vadd.f32 %v1890_v13, %v1789_v52  ;;  %2340 = vtanh.f32 %v2035_v6  ;;  %v1567_v39 = vadd.f32 %v2921_v63, %v2897_v36  ;;  %v3119_v6 = vld [vmem:[#allocation8_spill] sm:$0xff] }
 0x1fc   :  { %v2993_v47 = vpop.f32.mrf.mxu1  ;;  %v1892_v21 = vpop.f32.mrf.mxu0  ;;  %v1801_v48 = vadd.f32 %v1672_v26, %v1573_v51  ;;  %v1785_v26 = vadd.f32 %v2965_v38, %v1557_v12  ;;  %v3120_v13 = vld [vmem:[#allocation12_spill] sm:$0xff]  ;;  %v1793_v57 = vadd.f32 %v2991_v22, %v1565_v62  ;;  %v1788_v19 = vadd.f32 %v2989_v7, %v1560_v27  ;;  %v3128_v62 = vld [vmem:[#allocation18_spill] sm:$0xff] }
 0x1fd   :  { %v2059_v31 = vmul.f32 0.5, %v2017_v56  ;;  %v2018_v30 = vadd.f32 %v1892_v21, %v1790_v28  ;;  %2342 = vtanh.f32 %v2036_v34  ;;  %v1795_v33 = vadd.f32 %v1668_v11, %v1567_v39  ;;  %v3123_v56 = vld [vmem:[#allocation22_spill] sm:$0xff] }
 0x1fe   :  { %v2999_v61 = vpop.f32.mrf.mxu1  ;;  %v1896_v15 = vpop.f32.mrf.mxu0  ;;  %v1787_v11 = vadd.f32 %v1764_v50, %v1559_v41  ;;  %v1563_v50 = vadd.f32 %v2941_v53, %v2891_v14  ;;  %v3040_v28 = vadd.f32 %v3120_v13, %v3119_v6  ;;  %v3121_v14 = vld [vmem:[#allocation20_spill] sm:$0xff]  ;;  %v1792_v32 = vadd.f32 %v3123_v56, %v1564_v4  ;;  %v3129_v6 = vld [vmem:[#allocation19_spill] sm:$0xff] }
 0x1ff   :  { %2344 = vtanh.f32 %v2059_v31  ;;  %v2060_v60 = vmul.f32 0.5, %v2018_v30  ;;  %v2023_v43 = vadd.f32 %v1896_v15, %v1795_v33  ;;  %v1786_v53 = vadd.f32 %v3121_v14, %v1558_v55  ;;  %v3130_v14 = vld [vmem:[#allocation25_spill] sm:$0xff] }
 0x200   :  { %v3006_v44 = vpop.f32.mrf.mxu1  ;;  %v1898_v2 = vpop.f32.mrf.mxu0  ;;  %v1791_v20 = vadd.f32 %v3122_v59, %v1563_v50  ;;  %v1794_v46 = vadd.f32 %v2993_v47, %v1566_v58  ;;  %v3127_v50 = vld [vmem:[#allocation11_spill] sm:$0xff]  ;;  %v1578_v13 = vadd.f32 %v3129_v6, %v3024_v16 }
 0x201   :  { %2346 = vtanh.f32 %v2060_v60  ;;  %v2024_v8 = vadd.f32 %v1898_v2, %v1796_v37  ;;  %v2083_v40 = vmul.f32 0.5, %v2023_v43  ;;  %v1576_v4 = vadd.f32 %v3128_v62, %v3127_v50 }
 0x202   :  { %v3011_v36 = vpop.f32.mrf.mxu1  ;;  %v1900_v63 = vpop.f32.mrf.mxu0 }
 0x203   :  { %v2029_v1 = vadd.f32 %v1900_v63, %v1801_v48  ;;  %v2084_v54 = vmul.f32 0.5, %v2024_v8 }
 0x204   :  { %v3015_v23 = vpop.f32.mrf.mxu1  ;;  %v1902_v45 = vpop.f32.mrf.mxu0 }
 0x205   :  { %v2030_v10 = vadd.f32 %v1902_v45, %v1802_v18  ;;  %2348 = vtanh.f32 %v2029_v1 }
 0x206   :  { %v1939_v49 = vpop.f32.mrf.mxu1  ;;  %v1992_v35 = vpop.f32.mrf.mxu0 }
 0x207   :  { %2350 = vtanh.f32 %v2030_v10  ;;  %v2013_v5 = vadd.f32 %v1939_v49, %v1785_v26  ;;  %v2015_v38 = vadd.f32 %v1992_v35, %v1787_v11  ;;  %v3124_v11 = vld [vmem:[#allocation10_spill] sm:$0xff]  ;;  %v3125_v10 = vld [vmem:[#allocation16_spill] sm:$0xff] }
 0x208   :  { %v1941_v3 = vpop.f32.mrf.mxu1  ;;  %v1994_v52 = vpop.f32.mrf.mxu0  ;;  %2352 = vtanh.f32 %v2083_v40  ;;  %v1575_v55 = vadd.f32 %v3125_v10, %v3124_v11  ;;  %v2113_v49 = vld [vmem:[%s3097_s2] sm:$0xff] }
 0x209   :  { %v2341_v34 = vpop.eup %2340  ;;  %v2037_v21 = vmul.f32 0.5, %v2013_v5  ;;  %v2039_v0 = vmul.f32 0.5, %v2015_v38  ;;  %2354 = vtanh.f32 %v2084_v54  ;;  %v2014_v42 = vadd.f32 %v1941_v3, %v1786_v53  ;;  %v3126_v5 = vld [vmem:[#allocation17_spill] sm:$0xff] }
 0x20a   :  { %v1943_v17 = vpop.f32.mrf.mxu1  ;;  %v1996_v31 = vpop.f32.mrf.mxu0  ;;  %v2047_v29 = vmul.f32 0.5, %v2341_v34  ;;  %v2016_v22 = vadd.f32 %v1994_v52, %v1788_v19  ;;  %v1577_v38 = vadd.f32 %v3126_v5, %v3020_v24  ;;  %v2114_v3 = vld [vmem:[%s3097_s2 + $0x8] sm:$0xff]  ;;  %v1803_v53 = vadd.f32 %v3130_v14, %v1575_v55  ;;  %v3132_v19 = vld [vmem:[#allocation26_spill] sm:$0xff] }
 0x20b   :  { %v2343_v25 = vpop.eup %2342  ;;  %v2019_v15 = vadd.f32 %v1943_v17, %v1791_v20  ;;  %v2021_v39 = vadd.f32 %v1996_v31, %v1793_v57  ;;  %2356 = vtanh.f32 %v2037_v21  ;;  %v2038_v1 = vmul.f32 0.5, %v2014_v42  ;;  %v3131_v31 = vld [vmem:[#allocation23_spill] sm:$0xff] }
 0x20c   :  { %v2345_v30 = vpop.eup %2344  ;;  %v1945_v51 = vpop.f32.mrf.mxu1  ;;  %v2048_v63 = vmul.f32 0.5, %v2343_v25  ;;  %2358 = vtanh.f32 %v2039_v0  ;;  %v2040_v40 = vmul.f32 0.5, %v2016_v22  ;;  %v2053_v54 = vadd.f32 0.5, %v2047_v29  ;;  %v3135_v22 = vld [vmem:[#allocation13_spill] sm:$0xff] }
 0x20d   :  { %v1998_v60 = vpop.f32.mrf.mxu0  ;;  %v2071_v2 = vmul.f32 0.5, %v2345_v30  ;;  %v2020_v9 = vadd.f32 %v1945_v51, %v1792_v32  ;;  %v2061_v48 = vmul.f32 0.5, %v2019_v15  ;;  %v2063_v12 = vmul.f32 0.5, %v2021_v39  ;;  %v3133_v39 = vld [vmem:[#allocation9_spill] sm:$0xff]  ;;  %v3134_v51 = vld [vmem:[#allocation14_spill] sm:$0xff] }
 0x20e   :  { %v2347_v33 = vpop.eup %2346  ;;  %v2022_v7 = vadd.f32 %v1998_v60, %v1794_v46  ;;  %v1949_v37 = vpop.f32.mrf.mxu1  ;;  %v2054_v34 = vadd.f32 0.5, %v2048_v63  ;;  %v1805_v20 = vadd.f32 %v3011_v36, %v1577_v38  ;;  %v1797_v25 = vadd.f32 %v3131_v31, %v3040_v28 }
 0x20f   :  { %v2002_v47 = vpop.f32.mrf.mxu0  ;;  %v2072_v41 = vmul.f32 0.5, %v2347_v33  ;;  %v2062_v18 = vmul.f32 0.5, %v2020_v9  ;;  %v2077_v43 = vadd.f32 0.5, %v2071_v2  ;;  %2360 = vtanh.f32 %v2061_v48  ;;  %v3136_v48 = vld [vmem:[#allocation24_spill] sm:$0xff] }
 0x210   :  { %v2064_v8 = vmul.f32 0.5, %v2022_v7  ;;  %v1951_v45 = vpop.f32.mrf.mxu1  ;;  %2362 = vtanh.f32 %v2063_v12  ;;  %v1804_v16 = vadd.f32 %v3132_v19, %v1576_v4  ;;  %v1806_v30 = vadd.f32 %v3015_v23, %v1578_v13 }
 0x211   :  { %v2004_v26 = vpop.f32.mrf.mxu0  ;;  %v2078_v35 = vadd.f32 0.5, %v2072_v41  ;;  %2364 = vtanh.f32 %v2062_v18  ;;  %v2119_v59 = vmul.f32 %v2113_v49, %v2077_v43  ;;  %v1570_v60 = vadd.f32 %v3134_v51, %v3133_v39  ;;  %v3137_v41 = vld [vmem:[#allocation15_spill] sm:$0xff] }
 0x212   :  { %v1953_v52 = vpop.f32.mrf.mxu1  ;;  %v2349_v58 = vpop.eup %2348  ;;  %2366 = vtanh.f32 %v2064_v8  ;;  %v1799_v28 = vadd.f32 %v2999_v61, %v3135_v22  ;;  %v2025_v9 = vadd.f32 %v1949_v37, %v1797_v25  ;;  %v1800_v18 = vadd.f32 %v3006_v44, %v3137_v41 }
 0x213   :  { %v2006_v27 = vpop.f32.mrf.mxu0  ;;  %v2125_v56 = vmul.f32 %v2349_v58, %v2053_v54  ;;  %2368 = vtanh.f32 %v2038_v1  ;;  %v2120_v32 = vmul.f32 %v2114_v3, %v2078_v35  ;;  %v2031_v21 = vadd.f32 %v1953_v52, %v1803_v53 }
 0x214   :  { %v2351_v24 = vpop.eup %2350  ;;  %2370 = vtanh.f32 %v2040_v40  ;;  %v1955_v17 = vpop.f32.mrf.mxu1  ;;  %v2033_v15 = vadd.f32 %v2006_v27, %v1805_v20  ;;  %v1798_v23 = vadd.f32 %v3136_v48, %v1570_v60  ;;  %v2027_v7 = vadd.f32 %v2002_v47, %v1799_v28 }
 0x215   :  { %v2126_v57 = vmul.f32 %v2351_v24, %v2054_v34  ;;  %v2131_v46 = vadd.f32 %v2125_v56, %v2119_v59  ;;  %v2008_v0 = vpop.f32.mrf.mxu0  ;;  %2372 = vtanh.f32 %v2031_v21  ;;  %v2353_v36 = vpop.eup %2352  ;;  %v2032_v29 = vadd.f32 %v1955_v17, %v1804_v16  ;;  %v2117_v56 = vld [vmem:[%s3097_s2 + $0x20] sm:$0xff]  ;;  %v2116_v17 = vld [vmem:[%s3097_s2 + $0x18] sm:$0xff] }
 0x216   :  { %v2355_v2 = vpop.eup %2354  ;;  %v2034_v33 = vadd.f32 %v2008_v0, %v1806_v30  ;;  %v2026_v43 = vadd.f32 %v1951_v45, %v1798_v23  ;;  %v2085_v8 = vmul.f32 0.5, %v2025_v9  ;;  %v2028_v10 = vadd.f32 %v2004_v26, %v1800_v18  ;;  %v2115_v45 = vld [vmem:[%s3097_s2 + $0x10] sm:$0xff]  ;;  %v2118_v0 = vld [vmem:[%s3097_s2 + $0x28] sm:$0xff]  ;;  %s2400_s2 = scalar_lea.vmem %s2179_s0, 768 }
 0x217   :  { %v2132_v42 = vadd.f32 %v2126_v57, %v2120_v32  ;;  %2374 = vtanh.f32 %v2131_v46  ;;  %2149 = vst [vmem:[#allocation4] sm:$0xff] %v2131_v46  ;;  %v2087_v49 = vmul.f32 0.5, %v2027_v7  ;;  %v2095_v40 = vmul.f32 0.5, %v2353_v36  ;;  %p2401_p0 = scmp.ne.s32.totalorder %s2179_s0, %s2400_s2  ;;  %p2406_p2 = scmp.lt.s32.totalorder %s2400_s2, %s2400_s2 }
 0x218   :  { %v2357_v12 = vpop.eup %2356  ;;  %v2096_v5 = vmul.f32 0.5, %v2355_v2  ;;  %v2086_v47 = vmul.f32 0.5, %v2026_v43  ;;  %v2088_v54 = vmul.f32 0.5, %v2028_v10 }
 0x219   :  { %2376 = vtanh.f32 %v2132_v42  ;;  %2150 = vst [vmem:[#allocation4 + $0x8] sm:$0xff] %v2132_v42  ;;  %v2359_v63 = vpop.eup %2358  ;;  %v2049_v37 = vmul.f32 0.5, %v2357_v12  ;;  %v2101_v58 = vadd.f32 0.5, %v2095_v40  ;;  %p2407_p3 = por %p2406_p2, %p2405_p1 }
 0x21a   :  { %2378 = vtanh.f32 %v2033_v15  ;;  %v2051_v26 = vmul.f32 0.5, %v2359_v63  ;;  %v2102_v6 = vadd.f32 0.5, %v2096_v5 }
 0x21b   :  { %2380 = vtanh.f32 %v2032_v29  ;;  %v2055_v3 = vadd.f32 0.5, %v2049_v37  ;;  %p2408_p4 = pnand %p2407_p3, %p2401_p0 }
 0x21c   :  { %v2361_v1 = vpop.eup %2360  ;;  %2382 = vtanh.f32 %v2034_v33  ;;  %v2057_v21 = vadd.f32 0.5, %v2051_v26 }
 0x21d   :  { %v2363_v11 = vpop.eup %2362  ;;  %v2073_v61 = vmul.f32 0.5, %v2361_v1  ;;  %2384 = vtanh.f32 %v2085_v8 }
 0x21e   :  { %v2365_v55 = vpop.eup %2364  ;;  %v2075_v62 = vmul.f32 0.5, %v2363_v11  ;;  %2386 = vtanh.f32 %v2087_v49 }
 0x21f   :  { %v2367_v35 = vpop.eup %2366  ;;  %v2079_v50 = vadd.f32 0.5, %v2073_v61  ;;  %v2074_v4 = vmul.f32 0.5, %v2365_v55  ;;  %2388 = vtanh.f32 %v2086_v47 }
 0x220   :  { %v2369_v38 = vpop.eup %2368  ;;  %v2076_v52 = vmul.f32 0.5, %v2367_v35  ;;  %v2081_v24 = vadd.f32 0.5, %v2075_v62  ;;  %2390 = vtanh.f32 %v2088_v54 }
 0x221   :  { %v2371_v44 = vpop.eup %2370  ;;  %v2050_v13 = vmul.f32 0.5, %v2369_v38  ;;  %v2121_v34 = vmul.f32 %v2115_v45, %v2079_v50  ;;  %v2080_v32 = vadd.f32 0.5, %v2074_v4 }
 0x222   :  { %v2373_v27 = vpop.eup %2372  ;;  %v2052_v53 = vmul.f32 0.5, %v2371_v44  ;;  %v2082_v31 = vadd.f32 0.5, %v2076_v52  ;;  %v2123_v15 = vmul.f32 %v2117_v56, %v2081_v24 }
 0x223   :  { %v2127_v59 = vmul.f32 %v2373_v27, %v2055_v3  ;;  %v2056_v46 = vadd.f32 0.5, %v2050_v13  ;;  %v2122_v51 = vmul.f32 %v2116_v17, %v2080_v32 }
 0x224   :  { %v2375_v14 = vpop.eup %2374  ;;  %v2058_v42 = vadd.f32 0.5, %v2052_v53  ;;  %v2124_v29 = vmul.f32 %v2118_v0, %v2082_v31 }
 0x225   :  { %v2143_v57 = vmul.f32 %v2375_v14, %v2101_v58  ;;  %v2133_v25 = vadd.f32 %v2127_v59, %v2121_v34 }
 0x226   :  { %v2377_v20 = vpop.eup %2376 }
 0x227   :  { %v2144_v19 = vmul.f32 %v2377_v20, %v2102_v6  ;;  %v2379_v16 = vpop.eup %2378  ;;  %2156 = vst [vmem:[#allocation2] sm:$0xff] %v2143_v57  ;;  %2392 = vtanh.f32 %v2133_v25  ;;  %2151 = vst [vmem:[#allocation4 + $0x10] sm:$0xff] %v2133_v25 }
 0x228   :  { %v2381_v30 = vpop.eup %2380  ;;  %v2129_v36 = vmul.f32 %v2379_v16, %v2057_v21 }
 0x229   :  { %2157 = vst [vmem:[#allocation2 + $0x8] sm:$0xff] %v2144_v19  ;;  %v2383_v39 = vpop.eup %2382  ;;  %v2128_v60 = vmul.f32 %v2381_v30, %v2056_v46 }
 0x22a   :  { %v2135_v2 = vadd.f32 %v2129_v36, %v2123_v15  ;;  %v2130_v22 = vmul.f32 %v2383_v39, %v2058_v42  ;;  %v2385_v33 = vpop.eup %2384 }
 0x22b   :  { %v2134_v28 = vadd.f32 %v2128_v60, %v2122_v51  ;;  %v2387_v48 = vpop.eup %2386 }
 0x22c   :  { %2394 = vtanh.f32 %v2135_v2  ;;  %2153 = vst [vmem:[#allocation4 + $0x20] sm:$0xff] %v2135_v2  ;;  %v2136_v9 = vadd.f32 %v2130_v22, %v2124_v29 }
 0x22d   :  { %2396 = vtanh.f32 %v2134_v28  ;;  %2152 = vst [vmem:[#allocation4 + $0x18] sm:$0xff] %v2134_v28 }
 0x22e   :  { %2398 = vtanh.f32 %v2136_v9  ;;  %2155 = vst.msk [vmem:[#allocation4 + $0x28] sm:$0xff] %vm2154_vm9, %v2136_v9 }
 0x22f   :  { %2411 = shalt.err (!%p2408_p4)
}
 0x230   :  { %2181 = dma.vmem_to_hbm [thread:$0]  %s2179_s0, 768, %s3099_s4, [#allocation5]   ;;  %v2389_v23 = vpop.eup %2388  ;;  %v2097_v12 = vmul.f32 0.5, %v2385_v33  ;;  %v2099_v41 = vmul.f32 0.5, %v2387_v48 }
 0x231   :  { %v2391_v7 = vpop.eup %2390  ;;  %v2098_v43 = vmul.f32 0.5, %v2389_v23  ;;  %s2454_s5 = smov [#allocation2]  }
 0x232   :  { %v2103_v63 = vadd.f32 0.5, %v2097_v12  ;;  %v2100_v1 = vmul.f32 0.5, %v2391_v7  ;;  %v2105_v11 = vadd.f32 0.5, %v2099_v41  ;;  %s2168_s6 = sshll.u32 %s2454_s5, 4  ;;  %s2169_s6 = int_to_ptr.vmem [resolvable:$true] %s2168_s6 }
 0x233   :  { %v2104_v10 = vadd.f32 0.5, %v2098_v43  ;;  %s2420_s4 = scalar_lea.vmem %s2169_s6, 768  ;;  %p2425_p6 = scmp.lt.s32.totalorder %s2169_s6, %s2169_s6 }
 0x234   :  { %v2393_v18 = vpop.eup %2392  ;;  %v2106_v37 = vadd.f32 0.5, %v2100_v1  ;;  %p2421_p5 = scmp.ne.s32.totalorder %s2169_s6, %s2420_s4  ;;  %p2426_p7 = scmp.lt.s32.totalorder %s2420_s4, %s2420_s4 }
 0x235   :  { %v2145_v8 = vmul.f32 %v2393_v18, %v2103_v63 }
 0x236   :  { %p2427_p8 = por %p2426_p7, %p2425_p6 }
 0x237   :  { %2158 = vst [vmem:[#allocation2 + $0x10] sm:$0xff] %v2145_v8 }
 0x238   :  { %p2428_p9 = pnand %p2427_p8, %p2421_p5 }
 0x239   :  { %v2395_v61 = vpop.eup %2394 }
 0x23a   :  { %v2397_v55 = vpop.eup %2396  ;;  %v2147_v49 = vmul.f32 %v2395_v61, %v2105_v11 }
 0x23b   :  { %v2399_v35 = vpop.eup %2398  ;;  %v2146_v40 = vmul.f32 %v2397_v55, %v2104_v10 }
 0x23c   :  { %v2148_v5 = vmul.f32 %v2399_v35, %v2106_v37  ;;  %2160 = vst [vmem:[#allocation2 + $0x20] sm:$0xff] %v2147_v49 }
 0x23d   :  { %2159 = vst [vmem:[#allocation2 + $0x18] sm:$0xff] %v2146_v40 }
 0x23e   :  { %2161 = vst.msk [vmem:[#allocation2 + $0x28] sm:$0xff] %vm2154_vm9, %v2148_v5 }
 0x23f   :  { %2431 = shalt.err (!%p2428_p9)
}
 0x240   :  { %2171 = dma.vmem_to_hbm [thread:$0]  %s2169_s6, 768, %s3098_s3, [#allocation3]  }
 0x241   :  { %2440 = dma.done.wait [#allocation3], 768  }
 0x242   :  { %2441 = vsyncadd [#allocation3], 4294966528 }
 0x243   :  { %2442 = dma.done.wait [#allocation5], 768  }
 0x244   :  { %2443 = vsyncadd [#allocation5], 4294966528 }
 0x245   :  { %2188 = vsyncpa [#allocation3], 1 }
 0x246   :  { %2189 = vsyncpa [#allocation5], 1 }

</bundles_post_ra>
